<compile_context>
chip_gen: v7x
topology: tpu7x:2x2x1
jax: 0.10.0
libtpu: 0.0.40
codegen_flags: <defaults>
</compile_context>

<pallas_src>
import functools
import math

import jax
import jax.numpy as jnp
from jax import lax
from jax.experimental import pallas as pl
from jax.experimental.pallas import tpu as pltpu


def _pick_tile_h(H):
    """Largest H-tile <= 64 rows (multiple of 8) dividing H; else the whole H."""
    for th in (64, 56, 48, 40, 32, 24, 16, 8):
        if th <= H and H % th == 0:
            return th
    return H


# --------------------------------------------------------------------------
# Fused kernel, one grid step per (image, H-tile):
#   x_ref   : (1, TH, W, Cin)   main input rows of this tile (NHWC)
#   xt_ref  : (1, 1,  W, Cin)   input row just above the tile (clamped at top)
#   xb_ref  : (1, 1,  W, Cin)   input row just below the tile (clamped at bot)
#   w1_ref  : (Cin, C1)         pointwise weight, BN1 scale folded in
#   b1_ref  : (1, C1)           BN1 bias
#   w2_ref  : (9, C2)           depthwise 3x3 weight (taps flat), BN2 folded in
#   b2_ref  : (1, C2)           BN2 bias
#   o_ref   : (1, TH, W, C1+C2) output tile: [..., :C1] = x1, rest = x2
#   x1p_ref : (TH+2, W+2, C1)   VMEM scratch: zero-padded x1 tile
# --------------------------------------------------------------------------
def _ghost_kernel(x_ref, xt_ref, xb_ref, w1_ref, b1_ref, w2_ref, b2_ref,
                  o_ref, x1p_ref, *, matmul_bf16):
    i = pl.program_id(1)
    n_tiles = pl.num_programs(1)
    _, TH, W, Cin = x_ref.shape
    C1 = w1_ref.shape[1]
    C2 = w2_ref.shape[1]

    def pointwise(x3d):
        """ReLU(x3d @ w1 + b1): (rows, W, Cin) -> (rows, W, C1)."""
        rows = x3d.shape[0]
        x2d = x3d.reshape(rows * W, Cin)
        if Cin <= 8:
            # Tiny contraction: VPU broadcast-FMA, no MXU push/drain latency.
            y = x2d[:, 0:1] * w1_ref[0, :]
            for c in range(1, Cin):
                y = y + x2d[:, c:c + 1] * w1_ref[c, :]
        else:
            lhs = x2d
            rhs = w1_ref[...]
            if matmul_bf16:                       # v6e/v7x: halve operand bytes,
                lhs = lhs.astype(jnp.bfloat16)    # keep f32 accumulation
                rhs = rhs.astype(jnp.bfloat16)
            y = jnp.dot(lhs, rhs, preferred_element_type=jnp.float32)
        y = jnp.maximum(y + b1_ref[0, :], 0.0)
        return y.reshape(rows, W, C1)

    # --- primary 1x1 conv for the tile's TH rows and its two halo rows -----
    x1_main = pointwise(x_ref[0])          # (TH, W, C1)
    x1_top = pointwise(xt_ref[0])          # (1,  W, C1)
    x1_bot = pointwise(xb_ref[0])          # (1,  W, C1)

    # --- stage zero-padded x1 tile in VMEM: zero ONLY the border strips -----
    x1p_ref[:, 0:1, :] = jnp.zeros((TH + 2, 1, C1), jnp.float32)
    x1p_ref[:, W + 1:W + 2, :] = jnp.zeros((TH + 2, 1, C1), jnp.float32)
    x1p_ref[1:TH + 1, 1:W + 1, :] = x1_main
    x1p_ref[0:1, 1:W + 1, :] = x1_top
    x1p_ref[TH + 1:TH + 2, 1:W + 1, :] = x1_bot

    # Image-boundary tiles: the halo row lies outside the image -> must be the
    # depthwise zero-padding, not conv(clamped row).  Keyed on this step's own
    # program_id (no cross-step scratch persistence assumed -> megacore safe).
    @pl.when(i == 0)
    def _():
        x1p_ref[0:1, :, :] = jnp.zeros((1, W + 2, C1), jnp.float32)

    @pl.when(i == n_tiles - 1)
    def _():
        x1p_ref[TH + 1:TH + 2, :, :] = jnp.zeros((1, W + 2, C1), jnp.float32)

    # --- cheap op: 3x3 depthwise (+ folded BN2, ReLU) -----------------------
    # ratio == 2  =>  C2 == C1 and the group->channel map is the identity.
    # The sublane-misaligned W-shift is hoisted out of the dh loop: 3 shifted
    # reads instead of 9; the dh pick on the loaded value is an aligned
    # whole-plane select.  Accumulator starts at the first tap; bias is fused
    # into the final ReLU (no zero+bias init pass).
    acc = None
    for dw in range(3):
        col = x1p_ref[:, dw:dw + W, :]                    # (TH+2, W, C1)
        for dh in range(3):
            term = col[dh:dh + TH] * w2_ref[dh * 3 + dw, :]
            acc = term if acc is None else acc + term
    x2 = jnp.maximum(acc + b2_ref[0, :], 0.0)             # (TH, W, C2)

    # --- fused concat: write both halves straight into the output block ----
    o_ref[0, :, :, 0:C1] = x1_main.astype(o_ref.dtype)
    o_ref[0, :, :, C1:C1 + C2] = x2.astype(o_ref.dtype)


def ghost_fused(x_nhwc, w1f, b1, w2f, b2, *, tile_h=None, matmul_bf16=False):
    """x_nhwc: (N,H,W,Cin) f32; returns (N,H,W,C1+C2) f32."""
    N, H, W, Cin = x_nhwc.shape
    C1 = w1f.shape[1]
    C2 = w2f.shape[1]
    Ctot = C1 + C2

    TH = _pick_tile_h(H) if tile_h is None else tile_h
    assert H % TH == 0, f"tile_h={TH} must divide H={H}"
    nH = H // TH

    kernel = functools.partial(_ghost_kernel, matmul_bf16=matmul_bf16)

    # VMEM budget derived from actual block sizes (double-buffered pipeline
    # blocks + scratch, plus margin for in-kernel temporaries), capped at
    # v7x's 64 MiB physical VMEM.
    block_bytes = 4 * (TH * W * Cin + 2 * W * Cin            # input tile + halos
                       + Cin * C1 + C1 + 9 * C2 + C2         # weights / biases
                       + TH * W * Ctot)                      # output tile
    scratch_bytes = 4 * (TH + 2) * (W + 2) * C1
    vmem_limit = 2 * block_bytes + scratch_bytes
    vmem_limit = min(64 * 1024 * 1024, max(16 * 1024 * 1024, 4 * vmem_limit))

    # NOTE: if the input DMA is still exposed at very small Cin, the main
    # input spec can take pipeline_mode=pl.Buffered(3).
    return pl.pallas_call(
        kernel,
        out_shape=jax.ShapeDtypeStruct((N, H, W, Ctot), jnp.float32),
        grid_spec=pltpu.PrefetchScalarGridSpec(
            num_scalar_prefetch=0,
            grid=(N, nH),
            in_specs=[
                # main TH-row tile
                pl.BlockSpec((1, TH, W, Cin), lambda n, i: (n, i, 0, 0)),
                # 1-row halo above / below (row index clamped at the image
                # border; the kernel zeroes the corresponding padded-x1 row).
                pl.BlockSpec((1, 1, W, Cin),
                             lambda n, i: (n, jnp.maximum(i * TH - 1, 0), 0, 0)),
                pl.BlockSpec((1, 1, W, Cin),
                             lambda n, i: (n, jnp.minimum(i * TH + TH, H - 1), 0, 0)),
                pl.BlockSpec((Cin, C1), lambda n, i: (0, 0)),
                pl.BlockSpec((1, C1), lambda n, i: (0, 0)),
                pl.BlockSpec((9, C2), lambda n, i: (0, 0)),
                pl.BlockSpec((1, C2), lambda n, i: (0, 0)),
            ],
            out_specs=pl.BlockSpec((1, TH, W, Ctot), lambda n, i: (n, i, 0, 0)),
            scratch_shapes=[pltpu.VMEM((TH + 2, W + 2, C1), jnp.float32)],
        ),
        compiler_params=pltpu.CompilerParams(
            dimension_semantics=("parallel", "parallel"),
            vmem_limit_bytes=vmem_limit,
        ),
    )(x_nhwc, x_nhwc, x_nhwc, w1f, b1, w2f, b2)


# --------------------------------------------------------------------------
# Parameters (deterministic, eval-mode BN).
# --------------------------------------------------------------------------
def make_ghost_params(key, inp, oup, ratio=2, dw_size=3, eps=1e-5):
    init_channels = math.ceil(oup / ratio)
    new_channels = init_channels * (ratio - 1)
    ks = jax.random.split(key, 8)
    p = {}
    p["w1"] = jax.random.normal(ks[0], (inp, init_channels), jnp.float32) * 0.1
    p["w2"] = jax.random.normal(
        ks[1], (dw_size, dw_size, new_channels), jnp.float32) * 0.1
    g1 = 1.0 + 0.1 * jax.random.normal(ks[2], (init_channels,), jnp.float32)
    b1 = 0.1 * jax.random.normal(ks[3], (init_channels,), jnp.float32)
    m1 = 0.05 * jax.random.normal(ks[4], (init_channels,), jnp.float32)
    v1 = jnp.abs(1.0 + 0.1 * jax.random.normal(ks[5], (init_channels,), jnp.float32))
    p["scale1"] = g1 / jnp.sqrt(v1 + eps)
    p["bias1"] = b1 - m1 * p["scale1"]
    g2 = 1.0 + 0.1 * jax.random.normal(ks[6], (new_channels,), jnp.float32)
    b2 = 0.1 * jax.random.normal(ks[7], (new_channels,), jnp.float32)
    m2 = jnp.zeros((new_channels,), jnp.float32)
    v2 = jnp.ones((new_channels,), jnp.float32)
    p["scale2"] = g2 / jnp.sqrt(v2 + eps)
    p["bias2"] = b2 - m2 * p["scale2"]
    p["oup"] = oup
    p["ratio"] = ratio
    p["init_channels"] = init_channels
    p["new_channels"] = new_channels
    return p


# --------------------------------------------------------------------------
# GhostModule forward (Pallas).  x_nchw: (N, Cin, H, W) -> (N, oup, H, W).
# --------------------------------------------------------------------------
def ghost_module_forward(x_nchw, p, *, tile_h=None, matmul_bf16=False):
    assert p["ratio"] == 2, "fused Pallas kernel implements the ratio=2 config"
    C1, C2 = p["init_channels"], p["new_channels"]
    Ctot = C1 + C2

    # NCHW -> NHWC glue (kept to match the PyTorch interface).
    # TODO(synk): drop both transposes when the surrounding model is NHWC.
    x = jnp.transpose(x_nchw, (0, 2, 3, 1))

    # Fold BN scale into conv weights at parameter-prep time (free).
    w1f = p["w1"] * p["scale1"][None, :]                          # (Cin, C1)
    b1 = p["bias1"].reshape(1, C1)
    w2f = (p["w2"] * p["scale2"][None, None, :]).reshape(9, C2)   # (9, C2)
    b2 = p["bias2"].reshape(1, C2)

    out = ghost_fused(x, w1f, b1, w2f, b2, tile_h=tile_h,
                      matmul_bf16=matmul_bf16)                    # (N,H,W,Ctot)
    if p["oup"] < Ctot:                                           # only if oup odd
        out = out[..., :p["oup"]]
    return jnp.transpose(out, (0, 3, 1, 2))


# --------------------------------------------------------------------------
# Pure-JAX reference (correctness check only).
# --------------------------------------------------------------------------
def ghost_module_reference(x_nchw, p):
    C1, C2, ratio = p["init_channels"], p["new_channels"], p["ratio"]
    x = jnp.transpose(x_nchw, (0, 2, 3, 1))
    x1 = jnp.einsum("nhwc,cd->nhwd", x, p["w1"])
    x1 = jnp.maximum(x1 * p["scale1"] + p["bias1"], 0.0)
    w2_hwio = p["w2"].reshape(3, 3, 1, C2)
    ch_idx = jnp.arange(C2) // (ratio - 1)
    x1_g = x1[..., ch_idx]
    x2 = lax.conv_general_dilated(
        x1_g, w2_hwio, window_strides=(1, 1), padding="SAME",
        dimension_numbers=("NHWC", "HWIO", "NHWC"),
        feature_group_count=C2)
    x2 = jnp.maximum(x2 * p["scale2"] + p["bias2"], 0.0)
    out = jnp.concatenate([x1, x2], axis=-1)[..., : p["oup"]]
    return jnp.transpose(out, (0, 3, 1, 2))


if __name__ == "__main__":
    key = jax.random.PRNGKey(0)
    k_x, k_p, k_x2, k_p2 = jax.random.split(key, 4)

    # --- Config 1: tiny channels (VPU pointwise path), tile_h=8 forces two
    #     H-tiles so the halo / border-zero logic is exercised. -------------
    N, inp, oup, H, W = 2, 4, 8, 16, 16
    x = jax.random.normal(k_x, (N, inp, H, W), jnp.float32)
    params = make_ghost_params(k_p, inp, oup)
    out = jax.block_until_ready(ghost_module_forward(x, params, tile_h=8))
    assert out.shape == (N, oup, H, W), out.shape
    ref = jax.block_until_ready(ghost_module_reference(x, params))
    assert jnp.allclose(out, ref, atol=1e-4, rtol=1e-4), (
        float(jnp.max(jnp.abs(out - ref))))

    # --- Config 2: larger channel count -> MXU matmul path, auto tile. -----
    N2, inp2, oup2 = 2, 32, 64
    x2 = jax.random.normal(k_x2, (N2, inp2, H, W), jnp.float32)
    params2 = make_ghost_params(k_p2, inp2, oup2)
    out2 = jax.block_until_ready(ghost_module_forward(x2, params2))
    ref2 = jax.block_until_ready(ghost_module_reference(x2, params2))
    # Slightly relaxed to absorb f32 summation-order differences.
    assert jnp.allclose(out2, ref2, atol=1e-3, rtol=1e-3), (
        float(jnp.max(jnp.abs(out2 - ref2))))

    # bf16 matmul operands (v6e/v7x option), loose tolerance vs f32 reference.
    out2_bf = jax.block_until_ready(
        ghost_module_forward(x2, params2, matmul_bf16=True))
    assert jnp.allclose(out2_bf, ref2, atol=1e-1, rtol=1e-1), (
        float(jnp.max(jnp.abs(out2_bf - ref2))))

    print("KERNEL_OK")
</pallas_src>

<mosaic_0001>
module attributes {stable_mosaic.version = 11 : i64} {
  func.func @_ghost_kernel(%arg0: i32, %arg1: i32, %arg2: memref<1x8x16x4xf32, #tpu.memory_space<vmem>>, %arg3: memref<1x1x16x4xf32, #tpu.memory_space<vmem>>, %arg4: memref<1x1x16x4xf32, #tpu.memory_space<vmem>>, %arg5: memref<4x4xf32, #tpu.memory_space<vmem>>, %arg6: memref<1x4xf32, #tpu.memory_space<vmem>>, %arg7: memref<9x4xf32, #tpu.memory_space<vmem>>, %arg8: memref<1x4xf32, #tpu.memory_space<vmem>>, %arg9: memref<1x8x16x8xf32, #tpu.memory_space<vmem>>, %arg10: memref<10x18x4xf32, #tpu.memory_space<vmem>>) attributes {dimension_semantics = [#tpu.dimension_semantics<parallel>, #tpu.dimension_semantics<parallel>], iteration_bounds = array<i64: 2, 2>, scalar_prefetch = 0 : i64, scratch_operands = 1 : i64, tpu.core_type = #tpu.core_type<tc>, window_params = [{transform_indices = @transform_0, window_bounds = array<i64: 1, 8, 16, 4>}, {transform_indices = @transform_1, window_bounds = array<i64: 1, 1, 16, 4>}, {transform_indices = @transform_2, window_bounds = array<i64: 1, 1, 16, 4>}, {pipeline_mode = #tpu.pipeline_mode<synchronous>, transform_indices = @transform_3, window_bounds = array<i64: 4, 4>}, {pipeline_mode = #tpu.pipeline_mode<synchronous>, transform_indices = @transform_4, window_bounds = array<i64: 1, 4>}, {pipeline_mode = #tpu.pipeline_mode<synchronous>, transform_indices = @transform_5, window_bounds = array<i64: 9, 4>}, {pipeline_mode = #tpu.pipeline_mode<synchronous>, transform_indices = @transform_6, window_bounds = array<i64: 1, 4>}, {transform_indices = @transform_7, window_bounds = array<i64: 1, 8, 16, 8>}]} {
    %c0 = arith.constant 0 : index
    %c0_0 = arith.constant 0 : index
    %c0_1 = arith.constant 0 : index
    %c0_2 = arith.constant 0 : index
    %0 = vector.load %arg2[%c0, %c0_0, %c0_1, %c0_2] : memref<1x8x16x4xf32, #tpu.memory_space<vmem>>, vector<1x8x16x4xf32>
    %1 = vector.shape_cast %0 : vector<1x8x16x4xf32> to vector<8x16x4xf32>
    %2 = vector.shape_cast %1 : vector<8x16x4xf32> to vector<128x4xf32>
    %3 = vector.extract_strided_slice %2 {offsets = [0, 0], sizes = [128, 1], strides = [1, 1]} : vector<128x4xf32> to vector<128x1xf32>
    %c0_3 = arith.constant 0 : index
    %c0_4 = arith.constant 0 : index
    %4 = vector.load %arg5[%c0_3, %c0_4] : memref<4x4xf32, #tpu.memory_space<vmem>>, vector<1x4xf32>
    %5 = vector.shape_cast %4 : vector<1x4xf32> to vector<4xf32>
    %6 = vector.shape_cast %5 : vector<4xf32> to vector<1x4xf32>
    %7 = vector.broadcast %3 : vector<128x1xf32> to vector<128x4xf32>
    %8 = vector.broadcast %6 : vector<1x4xf32> to vector<128x4xf32>
    %9 = arith.mulf %7, %8 : vector<128x4xf32>
    %10 = vector.extract_strided_slice %2 {offsets = [0, 1], sizes = [128, 1], strides = [1, 1]} : vector<128x4xf32> to vector<128x1xf32>
    %c1 = arith.constant 1 : index
    %c0_5 = arith.constant 0 : index
    %11 = vector.load %arg5[%c1, %c0_5] : memref<4x4xf32, #tpu.memory_space<vmem>>, vector<1x4xf32>
    %12 = vector.shape_cast %11 : vector<1x4xf32> to vector<4xf32>
    %13 = vector.shape_cast %12 : vector<4xf32> to vector<1x4xf32>
    %14 = vector.broadcast %10 : vector<128x1xf32> to vector<128x4xf32>
    %15 = vector.broadcast %13 : vector<1x4xf32> to vector<128x4xf32>
    %16 = arith.mulf %14, %15 : vector<128x4xf32>
    %17 = arith.addf %9, %16 : vector<128x4xf32>
    %18 = vector.extract_strided_slice %2 {offsets = [0, 2], sizes = [128, 1], strides = [1, 1]} : vector<128x4xf32> to vector<128x1xf32>
    %c2 = arith.constant 2 : index
    %c0_6 = arith.constant 0 : index
    %19 = vector.load %arg5[%c2, %c0_6] : memref<4x4xf32, #tpu.memory_space<vmem>>, vector<1x4xf32>
    %20 = vector.shape_cast %19 : vector<1x4xf32> to vector<4xf32>
    %21 = vector.shape_cast %20 : vector<4xf32> to vector<1x4xf32>
    %22 = vector.broadcast %18 : vector<128x1xf32> to vector<128x4xf32>
    %23 = vector.broadcast %21 : vector<1x4xf32> to vector<128x4xf32>
    %24 = arith.mulf %22, %23 : vector<128x4xf32>
    %25 = arith.addf %17, %24 : vector<128x4xf32>
    %26 = vector.extract_strided_slice %2 {offsets = [0, 3], sizes = [128, 1], strides = [1, 1]} : vector<128x4xf32> to vector<128x1xf32>
    %c3 = arith.constant 3 : index
    %c0_7 = arith.constant 0 : index
    %27 = vector.load %arg5[%c3, %c0_7] : memref<4x4xf32, #tpu.memory_space<vmem>>, vector<1x4xf32>
    %28 = vector.shape_cast %27 : vector<1x4xf32> to vector<4xf32>
    %29 = vector.shape_cast %28 : vector<4xf32> to vector<1x4xf32>
    %30 = vector.broadcast %26 : vector<128x1xf32> to vector<128x4xf32>
    %31 = vector.broadcast %29 : vector<1x4xf32> to vector<128x4xf32>
    %32 = arith.mulf %30, %31 : vector<128x4xf32>
    %33 = arith.addf %25, %32 : vector<128x4xf32>
    %c0_8 = arith.constant 0 : index
    %c0_9 = arith.constant 0 : index
    %34 = vector.load %arg6[%c0_8, %c0_9] : memref<1x4xf32, #tpu.memory_space<vmem>>, vector<1x4xf32>
    %35 = vector.shape_cast %34 : vector<1x4xf32> to vector<4xf32>
    %36 = vector.shape_cast %35 : vector<4xf32> to vector<1x4xf32>
    %37 = vector.broadcast %36 : vector<1x4xf32> to vector<128x4xf32>
    %38 = arith.addf %33, %37 : vector<128x4xf32>
    %cst = arith.constant 0.000000e+00 : f32
    %39 = vector.broadcast %cst : f32 to vector<128x4xf32>
    %40 = arith.maximumf %38, %39 : vector<128x4xf32>
    %41 = vector.shape_cast %40 : vector<128x4xf32> to vector<8x16x4xf32>
    %c0_10 = arith.constant 0 : index
    %c0_11 = arith.constant 0 : index
    %c0_12 = arith.constant 0 : index
    %c0_13 = arith.constant 0 : index
    %42 = vector.load %arg3[%c0_10, %c0_11, %c0_12, %c0_13] : memref<1x1x16x4xf32, #tpu.memory_space<vmem>>, vector<1x1x16x4xf32>
    %43 = vector.shape_cast %42 : vector<1x1x16x4xf32> to vector<1x16x4xf32>
    %44 = vector.shape_cast %43 : vector<1x16x4xf32> to vector<16x4xf32>
    %45 = vector.extract_strided_slice %44 {offsets = [0, 0], sizes = [16, 1], strides = [1, 1]} : vector<16x4xf32> to vector<16x1xf32>
    %c0_14 = arith.constant 0 : index
    %c0_15 = arith.constant 0 : index
    %46 = vector.load %arg5[%c0_14, %c0_15] : memref<4x4xf32, #tpu.memory_space<vmem>>, vector<1x4xf32>
    %47 = vector.shape_cast %46 : vector<1x4xf32> to vector<4xf32>
    %48 = vector.shape_cast %47 : vector<4xf32> to vector<1x4xf32>
    %49 = vector.broadcast %45 : vector<16x1xf32> to vector<16x4xf32>
    %50 = vector.broadcast %48 : vector<1x4xf32> to vector<16x4xf32>
    %51 = arith.mulf %49, %50 : vector<16x4xf32>
    %52 = vector.extract_strided_slice %44 {offsets = [0, 1], sizes = [16, 1], strides = [1, 1]} : vector<16x4xf32> to vector<16x1xf32>
    %c1_16 = arith.constant 1 : index
    %c0_17 = arith.constant 0 : index
    %53 = vector.load %arg5[%c1_16, %c0_17] : memref<4x4xf32, #tpu.memory_space<vmem>>, vector<1x4xf32>
    %54 = vector.shape_cast %53 : vector<1x4xf32> to vector<4xf32>
    %55 = vector.shape_cast %54 : vector<4xf32> to vector<1x4xf32>
    %56 = vector.broadcast %52 : vector<16x1xf32> to vector<16x4xf32>
    %57 = vector.broadcast %55 : vector<1x4xf32> to vector<16x4xf32>
    %58 = arith.mulf %56, %57 : vector<16x4xf32>
    %59 = arith.addf %51, %58 : vector<16x4xf32>
    %60 = vector.extract_strided_slice %44 {offsets = [0, 2], sizes = [16, 1], strides = [1, 1]} : vector<16x4xf32> to vector<16x1xf32>
    %c2_18 = arith.constant 2 : index
    %c0_19 = arith.constant 0 : index
    %61 = vector.load %arg5[%c2_18, %c0_19] : memref<4x4xf32, #tpu.memory_space<vmem>>, vector<1x4xf32>
    %62 = vector.shape_cast %61 : vector<1x4xf32> to vector<4xf32>
    %63 = vector.shape_cast %62 : vector<4xf32> to vector<1x4xf32>
    %64 = vector.broadcast %60 : vector<16x1xf32> to vector<16x4xf32>
    %65 = vector.broadcast %63 : vector<1x4xf32> to vector<16x4xf32>
    %66 = arith.mulf %64, %65 : vector<16x4xf32>
    %67 = arith.addf %59, %66 : vector<16x4xf32>
    %68 = vector.extract_strided_slice %44 {offsets = [0, 3], sizes = [16, 1], strides = [1, 1]} : vector<16x4xf32> to vector<16x1xf32>
    %c3_20 = arith.constant 3 : index
    %c0_21 = arith.constant 0 : index
    %69 = vector.load %arg5[%c3_20, %c0_21] : memref<4x4xf32, #tpu.memory_space<vmem>>, vector<1x4xf32>
    %70 = vector.shape_cast %69 : vector<1x4xf32> to vector<4xf32>
    %71 = vector.shape_cast %70 : vector<4xf32> to vector<1x4xf32>
    %72 = vector.broadcast %68 : vector<16x1xf32> to vector<16x4xf32>
    %73 = vector.broadcast %71 : vector<1x4xf32> to vector<16x4xf32>
    %74 = arith.mulf %72, %73 : vector<16x4xf32>
    %75 = arith.addf %67, %74 : vector<16x4xf32>
    %c0_22 = arith.constant 0 : index
    %c0_23 = arith.constant 0 : index
    %76 = vector.load %arg6[%c0_22, %c0_23] : memref<1x4xf32, #tpu.memory_space<vmem>>, vector<1x4xf32>
    %77 = vector.shape_cast %76 : vector<1x4xf32> to vector<4xf32>
    %78 = vector.shape_cast %77 : vector<4xf32> to vector<1x4xf32>
    %79 = vector.broadcast %78 : vector<1x4xf32> to vector<16x4xf32>
    %80 = arith.addf %75, %79 : vector<16x4xf32>
    %cst_24 = arith.constant 0.000000e+00 : f32
    %81 = vector.broadcast %cst_24 : f32 to vector<16x4xf32>
    %82 = arith.maximumf %80, %81 : vector<16x4xf32>
    %83 = vector.shape_cast %82 : vector<16x4xf32> to vector<1x16x4xf32>
    %c0_25 = arith.constant 0 : index
    %c0_26 = arith.constant 0 : index
    %c0_27 = arith.constant 0 : index
    %c0_28 = arith.constant 0 : index
    %84 = vector.load %arg4[%c0_25, %c0_26, %c0_27, %c0_28] : memref<1x1x16x4xf32, #tpu.memory_space<vmem>>, vector<1x1x16x4xf32>
    %85 = vector.shape_cast %84 : vector<1x1x16x4xf32> to vector<1x16x4xf32>
    %86 = vector.shape_cast %85 : vector<1x16x4xf32> to vector<16x4xf32>
    %87 = vector.extract_strided_slice %86 {offsets = [0, 0], sizes = [16, 1], strides = [1, 1]} : vector<16x4xf32> to vector<16x1xf32>
    %c0_29 = arith.constant 0 : index
    %c0_30 = arith.constant 0 : index
    %88 = vector.load %arg5[%c0_29, %c0_30] : memref<4x4xf32, #tpu.memory_space<vmem>>, vector<1x4xf32>
    %89 = vector.shape_cast %88 : vector<1x4xf32> to vector<4xf32>
    %90 = vector.shape_cast %89 : vector<4xf32> to vector<1x4xf32>
    %91 = vector.broadcast %87 : vector<16x1xf32> to vector<16x4xf32>
    %92 = vector.broadcast %90 : vector<1x4xf32> to vector<16x4xf32>
    %93 = arith.mulf %91, %92 : vector<16x4xf32>
    %94 = vector.extract_strided_slice %86 {offsets = [0, 1], sizes = [16, 1], strides = [1, 1]} : vector<16x4xf32> to vector<16x1xf32>
    %c1_31 = arith.constant 1 : index
    %c0_32 = arith.constant 0 : index
    %95 = vector.load %arg5[%c1_31, %c0_32] : memref<4x4xf32, #tpu.memory_space<vmem>>, vector<1x4xf32>
    %96 = vector.shape_cast %95 : vector<1x4xf32> to vector<4xf32>
    %97 = vector.shape_cast %96 : vector<4xf32> to vector<1x4xf32>
    %98 = vector.broadcast %94 : vector<16x1xf32> to vector<16x4xf32>
    %99 = vector.broadcast %97 : vector<1x4xf32> to vector<16x4xf32>
    %100 = arith.mulf %98, %99 : vector<16x4xf32>
    %101 = arith.addf %93, %100 : vector<16x4xf32>
    %102 = vector.extract_strided_slice %86 {offsets = [0, 2], sizes = [16, 1], strides = [1, 1]} : vector<16x4xf32> to vector<16x1xf32>
    %c2_33 = arith.constant 2 : index
    %c0_34 = arith.constant 0 : index
    %103 = vector.load %arg5[%c2_33, %c0_34] : memref<4x4xf32, #tpu.memory_space<vmem>>, vector<1x4xf32>
    %104 = vector.shape_cast %103 : vector<1x4xf32> to vector<4xf32>
    %105 = vector.shape_cast %104 : vector<4xf32> to vector<1x4xf32>
    %106 = vector.broadcast %102 : vector<16x1xf32> to vector<16x4xf32>
    %107 = vector.broadcast %105 : vector<1x4xf32> to vector<16x4xf32>
    %108 = arith.mulf %106, %107 : vector<16x4xf32>
    %109 = arith.addf %101, %108 : vector<16x4xf32>
    %110 = vector.extract_strided_slice %86 {offsets = [0, 3], sizes = [16, 1], strides = [1, 1]} : vector<16x4xf32> to vector<16x1xf32>
    %c3_35 = arith.constant 3 : index
    %c0_36 = arith.constant 0 : index
    %111 = vector.load %arg5[%c3_35, %c0_36] : memref<4x4xf32, #tpu.memory_space<vmem>>, vector<1x4xf32>
    %112 = vector.shape_cast %111 : vector<1x4xf32> to vector<4xf32>
    %113 = vector.shape_cast %112 : vector<4xf32> to vector<1x4xf32>
    %114 = vector.broadcast %110 : vector<16x1xf32> to vector<16x4xf32>
    %115 = vector.broadcast %113 : vector<1x4xf32> to vector<16x4xf32>
    %116 = arith.mulf %114, %115 : vector<16x4xf32>
    %117 = arith.addf %109, %116 : vector<16x4xf32>
    %c0_37 = arith.constant 0 : index
    %c0_38 = arith.constant 0 : index
    %118 = vector.load %arg6[%c0_37, %c0_38] : memref<1x4xf32, #tpu.memory_space<vmem>>, vector<1x4xf32>
    %119 = vector.shape_cast %118 : vector<1x4xf32> to vector<4xf32>
    %120 = vector.shape_cast %119 : vector<4xf32> to vector<1x4xf32>
    %121 = vector.broadcast %120 : vector<1x4xf32> to vector<16x4xf32>
    %122 = arith.addf %117, %121 : vector<16x4xf32>
    %cst_39 = arith.constant 0.000000e+00 : f32
    %123 = vector.broadcast %cst_39 : f32 to vector<16x4xf32>
    %124 = arith.maximumf %122, %123 : vector<16x4xf32>
    %125 = vector.shape_cast %124 : vector<16x4xf32> to vector<1x16x4xf32>
    %cst_40 = arith.constant 0.000000e+00 : f32
    %126 = vector.broadcast %cst_40 : f32 to vector<10x1x4xf32>
    %c0_41 = arith.constant 0 : index
    %c0_42 = arith.constant 0 : index
    %c0_43 = arith.constant 0 : index
    %127 = vector.load %arg10[%c0_41, %c0_42, %c0_43] : memref<10x18x4xf32, #tpu.memory_space<vmem>>, vector<10x1x4xf32>
    tpu.vector_store %arg10[%c0_41, %c0_42, %c0_43], %126 {strides = array<i32>} : memref<10x18x4xf32, #tpu.memory_space<vmem>>, vector<10x1x4xf32>,
    %cst_44 = arith.constant 0.000000e+00 : f32
    %128 = vector.broadcast %cst_44 : f32 to vector<10x1x4xf32>
    %c0_45 = arith.constant 0 : index
    %c17 = arith.constant 17 : index
    %c0_46 = arith.constant 0 : index
    %129 = vector.load %arg10[%c0_45, %c17, %c0_46] : memref<10x18x4xf32, #tpu.memory_space<vmem>>, vector<10x1x4xf32>
    tpu.vector_store %arg10[%c0_45, %c17, %c0_46], %128 {strides = array<i32>} : memref<10x18x4xf32, #tpu.memory_space<vmem>>, vector<10x1x4xf32>,
    %c1_47 = arith.constant 1 : index
    %c1_48 = arith.constant 1 : index
    %c0_49 = arith.constant 0 : index
    %130 = vector.load %arg10[%c1_47, %c1_48, %c0_49] : memref<10x18x4xf32, #tpu.memory_space<vmem>>, vector<8x16x4xf32>
    tpu.vector_store %arg10[%c1_47, %c1_48, %c0_49], %41 {strides = array<i32>} : memref<10x18x4xf32, #tpu.memory_space<vmem>>, vector<8x16x4xf32>,
    %c0_50 = arith.constant 0 : index
    %c1_51 = arith.constant 1 : index
    %c0_52 = arith.constant 0 : index
    %131 = vector.load %arg10[%c0_50, %c1_51, %c0_52] : memref<10x18x4xf32, #tpu.memory_space<vmem>>, vector<1x16x4xf32>
    tpu.vector_store %arg10[%c0_50, %c1_51, %c0_52], %83 {strides = array<i32>} : memref<10x18x4xf32, #tpu.memory_space<vmem>>, vector<1x16x4xf32>,
    %c9 = arith.constant 9 : index
    %c1_53 = arith.constant 1 : index
    %c0_54 = arith.constant 0 : index
    %132 = vector.load %arg10[%c9, %c1_53, %c0_54] : memref<10x18x4xf32, #tpu.memory_space<vmem>>, vector<1x16x4xf32>
    tpu.vector_store %arg10[%c9, %c1_53, %c0_54], %125 {strides = array<i32>} : memref<10x18x4xf32, #tpu.memory_space<vmem>>, vector<1x16x4xf32>,
    %c0_i32 = arith.constant 0 : i32
    %133 = arith.cmpi eq, %arg1, %c0_i32 : i32
    %134 = arith.extui %133 : i1 to i32
    %c0_i32_55 = arith.constant 0 : i32
    %135 = arith.cmpi ne, %134, %c0_i32_55 : i32
    scf.if %135 {
      %cst_90 = arith.constant 0.000000e+00 : f32
      %217 = vector.broadcast %cst_90 : f32 to vector<1x18x4xf32>
      %c0_91 = arith.constant 0 : index
      %c0_92 = arith.constant 0 : index
      %c0_93 = arith.constant 0 : index
      %218 = vector.load %arg10[%c0_91, %c0_92, %c0_93] : memref<10x18x4xf32, #tpu.memory_space<vmem>>, vector<1x18x4xf32>
      tpu.vector_store %arg10[%c0_91, %c0_92, %c0_93], %217 {strides = array<i32>} : memref<10x18x4xf32, #tpu.memory_space<vmem>>, vector<1x18x4xf32>,
    } else {
    }
    %c1_i32 = arith.constant 1 : i32
    %136 = arith.cmpi eq, %arg1, %c1_i32 : i32
    %137 = arith.extui %136 : i1 to i32
    %c0_i32_56 = arith.constant 0 : i32
    %138 = arith.cmpi ne, %137, %c0_i32_56 : i32
    scf.if %138 {
      %cst_90 = arith.constant 0.000000e+00 : f32
      %217 = vector.broadcast %cst_90 : f32 to vector<1x18x4xf32>
      %c9_91 = arith.constant 9 : index
      %c0_92 = arith.constant 0 : index
      %c0_93 = arith.constant 0 : index
      %218 = vector.load %arg10[%c9_91, %c0_92, %c0_93] : memref<10x18x4xf32, #tpu.memory_space<vmem>>, vector<1x18x4xf32>
      tpu.vector_store %arg10[%c9_91, %c0_92, %c0_93], %217 {strides = array<i32>} : memref<10x18x4xf32, #tpu.memory_space<vmem>>, vector<1x18x4xf32>,
    } else {
    }
    %c0_57 = arith.constant 0 : index
    %c0_58 = arith.constant 0 : index
    %c0_59 = arith.constant 0 : index
    %139 = vector.load %arg10[%c0_57, %c0_58, %c0_59] : memref<10x18x4xf32, #tpu.memory_space<vmem>>, vector<10x16x4xf32>
    %140 = vector.extract_strided_slice %139 {offsets = [0, 0, 0], sizes = [8, 16, 4], strides = [1, 1, 1]} : vector<10x16x4xf32> to vector<8x16x4xf32>
    %c0_60 = arith.constant 0 : index
    %c0_61 = arith.constant 0 : index
    %141 = vector.load %arg7[%c0_60, %c0_61] : memref<9x4xf32, #tpu.memory_space<vmem>>, vector<1x4xf32>
    %142 = vector.shape_cast %141 : vector<1x4xf32> to vector<4xf32>
    %143 = vector.shape_cast %142 : vector<4xf32> to vector<1x1x4xf32>
    %144 = vector.broadcast %143 : vector<1x1x4xf32> to vector<8x16x4xf32>
    %145 = arith.mulf %140, %144 : vector<8x16x4xf32>
    %146 = vector.extract_strided_slice %139 {offsets = [1, 0, 0], sizes = [8, 16, 4], strides = [1, 1, 1]} : vector<10x16x4xf32> to vector<8x16x4xf32>
    %c3_62 = arith.constant 3 : index
    %c0_63 = arith.constant 0 : index
    %147 = vector.load %arg7[%c3_62, %c0_63] : memref<9x4xf32, #tpu.memory_space<vmem>>, vector<1x4xf32>
    %148 = vector.shape_cast %147 : vector<1x4xf32> to vector<4xf32>
    %149 = vector.shape_cast %148 : vector<4xf32> to vector<1x1x4xf32>
    %150 = vector.broadcast %149 : vector<1x1x4xf32> to vector<8x16x4xf32>
    %151 = arith.mulf %146, %150 : vector<8x16x4xf32>
    %152 = arith.addf %145, %151 : vector<8x16x4xf32>
    %153 = vector.extract_strided_slice %139 {offsets = [2, 0, 0], sizes = [8, 16, 4], strides = [1, 1, 1]} : vector<10x16x4xf32> to vector<8x16x4xf32>
    %c6 = arith.constant 6 : index
    %c0_64 = arith.constant 0 : index
    %154 = vector.load %arg7[%c6, %c0_64] : memref<9x4xf32, #tpu.memory_space<vmem>>, vector<1x4xf32>
    %155 = vector.shape_cast %154 : vector<1x4xf32> to vector<4xf32>
    %156 = vector.shape_cast %155 : vector<4xf32> to vector<1x1x4xf32>
    %157 = vector.broadcast %156 : vector<1x1x4xf32> to vector<8x16x4xf32>
    %158 = arith.mulf %153, %157 : vector<8x16x4xf32>
    %159 = arith.addf %152, %158 : vector<8x16x4xf32>
    %c0_65 = arith.constant 0 : index
    %c1_66 = arith.constant 1 : index
    %c0_67 = arith.constant 0 : index
    %160 = vector.load %arg10[%c0_65, %c1_66, %c0_67] : memref<10x18x4xf32, #tpu.memory_space<vmem>>, vector<10x16x4xf32>
    %161 = vector.extract_strided_slice %160 {offsets = [0, 0, 0], sizes = [8, 16, 4], strides = [1, 1, 1]} : vector<10x16x4xf32> to vector<8x16x4xf32>
    %c1_68 = arith.constant 1 : index
    %c0_69 = arith.constant 0 : index
    %162 = vector.load %arg7[%c1_68, %c0_69] : memref<9x4xf32, #tpu.memory_space<vmem>>, vector<1x4xf32>
    %163 = vector.shape_cast %162 : vector<1x4xf32> to vector<4xf32>
    %164 = vector.shape_cast %163 : vector<4xf32> to vector<1x1x4xf32>
    %165 = vector.broadcast %164 : vector<1x1x4xf32> to vector<8x16x4xf32>
    %166 = arith.mulf %161, %165 : vector<8x16x4xf32>
    %167 = arith.addf %159, %166 : vector<8x16x4xf32>
    %168 = vector.extract_strided_slice %160 {offsets = [1, 0, 0], sizes = [8, 16, 4], strides = [1, 1, 1]} : vector<10x16x4xf32> to vector<8x16x4xf32>
    %c4 = arith.constant 4 : index
    %c0_70 = arith.constant 0 : index
    %169 = vector.load %arg7[%c4, %c0_70] : memref<9x4xf32, #tpu.memory_space<vmem>>, vector<1x4xf32>
    %170 = vector.shape_cast %169 : vector<1x4xf32> to vector<4xf32>
    %171 = vector.shape_cast %170 : vector<4xf32> to vector<1x1x4xf32>
    %172 = vector.broadcast %171 : vector<1x1x4xf32> to vector<8x16x4xf32>
    %173 = arith.mulf %168, %172 : vector<8x16x4xf32>
    %174 = arith.addf %167, %173 : vector<8x16x4xf32>
    %175 = vector.extract_strided_slice %160 {offsets = [2, 0, 0], sizes = [8, 16, 4], strides = [1, 1, 1]} : vector<10x16x4xf32> to vector<8x16x4xf32>
    %c7 = arith.constant 7 : index
    %c0_71 = arith.constant 0 : index
    %176 = vector.load %arg7[%c7, %c0_71] : memref<9x4xf32, #tpu.memory_space<vmem>>, vector<1x4xf32>
    %177 = vector.shape_cast %176 : vector<1x4xf32> to vector<4xf32>
    %178 = vector.shape_cast %177 : vector<4xf32> to vector<1x1x4xf32>
    %179 = vector.broadcast %178 : vector<1x1x4xf32> to vector<8x16x4xf32>
    %180 = arith.mulf %175, %179 : vector<8x16x4xf32>
    %181 = arith.addf %174, %180 : vector<8x16x4xf32>
    %c0_72 = arith.constant 0 : index
    %c2_73 = arith.constant 2 : index
    %c0_74 = arith.constant 0 : index
    %182 = vector.load %arg10[%c0_72, %c2_73, %c0_74] : memref<10x18x4xf32, #tpu.memory_space<vmem>>, vector<10x16x4xf32>
    %183 = vector.extract_strided_slice %182 {offsets = [0, 0, 0], sizes = [8, 16, 4], strides = [1, 1, 1]} : vector<10x16x4xf32> to vector<8x16x4xf32>
    %c2_75 = arith.constant 2 : index
    %c0_76 = arith.constant 0 : index
    %184 = vector.load %arg7[%c2_75, %c0_76] : memref<9x4xf32, #tpu.memory_space<vmem>>, vector<1x4xf32>
    %185 = vector.shape_cast %184 : vector<1x4xf32> to vector<4xf32>
    %186 = vector.shape_cast %185 : vector<4xf32> to vector<1x1x4xf32>
    %187 = vector.broadcast %186 : vector<1x1x4xf32> to vector<8x16x4xf32>
    %188 = arith.mulf %183, %187 : vector<8x16x4xf32>
    %189 = arith.addf %181, %188 : vector<8x16x4xf32>
    %190 = vector.extract_strided_slice %182 {offsets = [1, 0, 0], sizes = [8, 16, 4], strides = [1, 1, 1]} : vector<10x16x4xf32> to vector<8x16x4xf32>
    %c5 = arith.constant 5 : index
    %c0_77 = arith.constant 0 : index
    %191 = vector.load %arg7[%c5, %c0_77] : memref<9x4xf32, #tpu.memory_space<vmem>>, vector<1x4xf32>
    %192 = vector.shape_cast %191 : vector<1x4xf32> to vector<4xf32>
    %193 = vector.shape_cast %192 : vector<4xf32> to vector<1x1x4xf32>
    %194 = vector.broadcast %193 : vector<1x1x4xf32> to vector<8x16x4xf32>
    %195 = arith.mulf %190, %194 : vector<8x16x4xf32>
    %196 = arith.addf %189, %195 : vector<8x16x4xf32>
    %197 = vector.extract_strided_slice %182 {offsets = [2, 0, 0], sizes = [8, 16, 4], strides = [1, 1, 1]} : vector<10x16x4xf32> to vector<8x16x4xf32>
    %c8 = arith.constant 8 : index
    %c0_78 = arith.constant 0 : index
    %198 = vector.load %arg7[%c8, %c0_78] : memref<9x4xf32, #tpu.memory_space<vmem>>, vector<1x4xf32>
    %199 = vector.shape_cast %198 : vector<1x4xf32> to vector<4xf32>
    %200 = vector.shape_cast %199 : vector<4xf32> to vector<1x1x4xf32>
    %201 = vector.broadcast %200 : vector<1x1x4xf32> to vector<8x16x4xf32>
    %202 = arith.mulf %197, %201 : vector<8x16x4xf32>
    %203 = arith.addf %196, %202 : vector<8x16x4xf32>
    %c0_79 = arith.constant 0 : index
    %c0_80 = arith.constant 0 : index
    %204 = vector.load %arg8[%c0_79, %c0_80] : memref<1x4xf32, #tpu.memory_space<vmem>>, vector<1x4xf32>
    %205 = vector.shape_cast %204 : vector<1x4xf32> to vector<4xf32>
    %206 = vector.shape_cast %205 : vector<4xf32> to vector<1x1x4xf32>
    %207 = vector.broadcast %206 : vector<1x1x4xf32> to vector<8x16x4xf32>
    %208 = arith.addf %203, %207 : vector<8x16x4xf32>
    %cst_81 = arith.constant 0.000000e+00 : f32
    %209 = vector.broadcast %cst_81 : f32 to vector<8x16x4xf32>
    %210 = arith.maximumf %208, %209 : vector<8x16x4xf32>
    %c0_82 = arith.constant 0 : index
    %c0_83 = arith.constant 0 : index
    %c0_84 = arith.constant 0 : index
    %c0_85 = arith.constant 0 : index
    %211 = vector.load %arg9[%c0_82, %c0_83, %c0_84, %c0_85] : memref<1x8x16x8xf32, #tpu.memory_space<vmem>>, vector<1x8x16x4xf32>
    %212 = vector.shape_cast %211 : vector<1x8x16x4xf32> to vector<8x16x4xf32>
    %213 = vector.shape_cast %41 : vector<8x16x4xf32> to vector<1x8x16x4xf32>
    tpu.vector_store %arg9[%c0_82, %c0_83, %c0_84, %c0_85], %213 {strides = array<i32>} : memref<1x8x16x8xf32, #tpu.memory_space<vmem>>, vector<1x8x16x4xf32>,
    %c0_86 = arith.constant 0 : index
    %c0_87 = arith.constant 0 : index
    %c0_88 = arith.constant 0 : index
    %c4_89 = arith.constant 4 : index
    %214 = vector.load %arg9[%c0_86, %c0_87, %c0_88, %c4_89] : memref<1x8x16x8xf32, #tpu.memory_space<vmem>>, vector<1x8x16x4xf32>
    %215 = vector.shape_cast %214 : vector<1x8x16x4xf32> to vector<8x16x4xf32>
    %216 = vector.shape_cast %210 : vector<8x16x4xf32> to vector<1x8x16x4xf32>
    tpu.vector_store %arg9[%c0_86, %c0_87, %c0_88, %c4_89], %216 {strides = array<i32>} : memref<1x8x16x8xf32, #tpu.memory_space<vmem>>, vector<1x8x16x4xf32>,
    return
  }
  func.func @transform_0(%arg0: i32, %arg1: i32) -> (i32, i32, i32, i32) {
    %c0_i32 = arith.constant 0 : i32
    %c0_i32_0 = arith.constant 0 : i32
    %c0_i32_1 = arith.constant 0 : i32
    return %arg0, %arg1, %c0_i32, %c0_i32_0 : i32, i32, i32, i32
  }
  func.func @transform_1(%arg0: i32, %arg1: i32) -> (i32, i32, i32, i32) {
    %c8_i32 = arith.constant 8 : i32
    %0 = arith.muli %arg1, %c8_i32 : i32
    %c1_i32 = arith.constant 1 : i32
    %1 = arith.subi %0, %c1_i32 : i32
    %c0_i32 = arith.constant 0 : i32
    %2 = arith.maxsi %1, %c0_i32 : i32
    %c0_i32_0 = arith.constant 0 : i32
    %c0_i32_1 = arith.constant 0 : i32
    %c0_i32_2 = arith.constant 0 : i32
    return %arg0, %2, %c0_i32_0, %c0_i32_1 : i32, i32, i32, i32
  }
  func.func @transform_2(%arg0: i32, %arg1: i32) -> (i32, i32, i32, i32) {
    %c8_i32 = arith.constant 8 : i32
    %0 = arith.muli %arg1, %c8_i32 : i32
    %c8_i32_0 = arith.constant 8 : i32
    %1 = arith.addi %0, %c8_i32_0 : i32
    %c15_i32 = arith.constant 15 : i32
    %2 = arith.minsi %1, %c15_i32 : i32
    %c0_i32 = arith.constant 0 : i32
    %c0_i32_1 = arith.constant 0 : i32
    %c0_i32_2 = arith.constant 0 : i32
    return %arg0, %2, %c0_i32, %c0_i32_1 : i32, i32, i32, i32
  }
  func.func @transform_3(%arg0: i32, %arg1: i32) -> (i32, i32) {
    %c0_i32 = arith.constant 0 : i32
    %c0_i32_0 = arith.constant 0 : i32
    %c0_i32_1 = arith.constant 0 : i32
    return %c0_i32, %c0_i32_0 : i32, i32
  }
  func.func @transform_4(%arg0: i32, %arg1: i32) -> (i32, i32) {
    %c0_i32 = arith.constant 0 : i32
    %c0_i32_0 = arith.constant 0 : i32
    %c0_i32_1 = arith.constant 0 : i32
    return %c0_i32, %c0_i32_0 : i32, i32
  }
  func.func @transform_5(%arg0: i32, %arg1: i32) -> (i32, i32) {
    %c0_i32 = arith.constant 0 : i32
    %c0_i32_0 = arith.constant 0 : i32
    %c0_i32_1 = arith.constant 0 : i32
    return %c0_i32, %c0_i32_0 : i32, i32
  }
  func.func @transform_6(%arg0: i32, %arg1: i32) -> (i32, i32) {
    %c0_i32 = arith.constant 0 : i32
    %c0_i32_0 = arith.constant 0 : i32
    %c0_i32_1 = arith.constant 0 : i32
    return %c0_i32, %c0_i32_0 : i32, i32
  }
  func.func @transform_7(%arg0: i32, %arg1: i32) -> (i32, i32, i32, i32) {
    %c0_i32 = arith.constant 0 : i32
    %c0_i32_0 = arith.constant 0 : i32
    %c0_i32_1 = arith.constant 0 : i32
    return %arg0, %arg1, %c0_i32, %c0_i32_0 : i32, i32, i32, i32
  }
}

</mosaic_0001>

<bundles_post_ra>
// kernel: tpu_custom_call.1
= control target key start
LH: loop header
LB: loop body
LE: loop exit
PB: predicated region body
PF: predicated region fallthrough
CT: control target
= control target key end

     0   :  { %s1935_s24 = smov 0   ;;  %s1937_s25 = smov 0   ;;  %s2972_s0 = inlined_call_operand.vmem [shape: f32[2,16,16,4], index: 0, kind: input, shape index: {}]   ;;  %s2973_s1 = inlined_call_operand.vmem [shape: f32[2,16,16,4], index: 1, kind: input, shape index: {}]   ;;  %s2974_s2 = inlined_call_operand.vmem [shape: f32[2,16,16,4], index: 2, kind: input, shape index: {}]   ;;  %s2975_s3 = inlined_call_operand.vmem [shape: f32[4,4], index: 3, kind: input, shape index: {}]   ;;  %s2976_s4 = inlined_call_operand.vmem [shape: f32[1,4], index: 4, kind: input, shape index: {}]   ;;  %s2977_s5 = inlined_call_operand.vmem [shape: f32[9,4], index: 5, kind: input, shape index: {}]   ;;  %s2978_s6 = inlined_call_operand.vmem [shape: f32[1,4], index: 6, kind: input, shape index: {}]   ;;  %s2979_s7 = inlined_call_operand.vmem [shape: f32[2,16,16,8], index: 7, kind: output, shape index: {}]  }
   0x1   :  { %s1939_s26 = smov 0   ;;  %s1941_s27 = smov 0  }
   0x2   :  { %s1943_s28 = smov 0  }
   0x3 LB: > { %s26_s29 = sadd.s32 1, %s1877_s26  ;;  %s29_s30 = sadd.s32 1, %s1881_s27  ;;  %s1885_s28 = sphi %s1943_s28, %s17_s28   ;;  %s1881_s27 = sphi %s1941_s27, %s2984_s27   ;;  %s1877_s26 = sphi %s1939_s26, %s2983_s26   ;;  %s1873_s25 = sphi %s1937_s25, %s2982_s25   ;;  %s1869_s24 = sphi %s1935_s24, %s2981_s24  }
   0x4   : > { %p27_p0 = scmp.ge.s32.totalorder %s26_s29, 2  ;;  %p1738_p1 = scmp.ge.s32.totalorder %s1885_s28, 1 }
   0x5   : > { %p323_p2 = scmp.lt.s32.totalorder %s1885_s28, 5 }
   0x6   : > { %s2986_s29 = smov (%p27_p0, %s26_s29), 0  ;;  %s2988_s30 = smov (!%p27_p0, %s29_s30), %s1881_s27 }
   0x7   : > { %p324_p3 = pnand %p1738_p1, %p323_p2  ;;  %p31_p4 = scmp.ge.s32.totalorder %s2988_s30, 2 }
   0x8   : > { %s1739_s8 = sshll.u32 (!%p324_p3), %s1869_s24, 3  ;;  %p392_p5 = scmp.lt.s32.totalorder (!%p324_p3), %s1873_s25, 1  ;;  %v1887_v0 = vmov (!%p324_p3), 0   ;;  %v1888_v18 = vmov (!%p324_p3), 1   ;;  %v1889_v19 = vmov (!%p324_p3), 2   ;;  %v1890_v22 = vmov (!%p324_p3), 3  }
   0x9   : > { %s2990_s30 = smov (%p31_p4, %s2988_s30), 0  ;;  %327 = sbr.rel (%p324_p3) target bundleno = 554 (0x22a), region = 48 }
   0xa   : > { %1834 = vset.pattern.permute.xlu1 (!%p324_p3), %v1887_v0  ;;  %1833 = vset.pattern.permute.xlu0 (!%p324_p3), %v1887_v0  ;;  %p394_p6 = scmp.lt.s32.totalorder (!%p324_p3), %s1739_s8, 15  ;;  %s420_s13 = sadd.s32 (!%p324_p3), 8, %s1739_s8  ;;  %v2150_v40 = vld [vmem:[%s2975_s3 + $0x1] ss:$0 sm:$0xff] (!%p324_p3)  ;;  %v2157_v42 = vld [vmem:[%s2975_s3] ss:$0 sm:$0xff] (!%p324_p3) }
   0xb   : > { %p1973_p7 = scmp.lt.s32.totalorder (!%p324_p3), %s420_s13, 15  ;;  %s1744_s22 = sadd.s32 (!%p324_p3), 4294967295, %s1739_s8  ;;  %vm1014_vm0 = vcmask (!%p324_p3), 24576   ;;  %vm1036_vm1 = vcmask (!%p324_p3), 31744  }
   0xc   : > { %p404_p8 = scmp.gt.s32.totalorder (!%p324_p3), %s1744_s22, 0  ;;  %p1745_p9 = scmp.lt.s32.totalorder (!%p324_p3), %s1744_s22, 15 }
   0xd   : > { %p1769_p10 = scmp.ne.s32.totalorder (!%p324_p3), %s1869_s24, 0 }
  0x10   : > { %s2992_s25 = smov (!%p392_p5, %s1873_s25), 1  ;;  %s2994_s13 = smov (!%p1973_p7, %s420_s13), 15 }
  0x11   : > { %s395_s9 = scalar_select %p394_p6, %s1739_s8, 15 }
  0x12   : > { %s1970_s10 = sshll.u32 %s2992_s25, 5  ;;  %s2996_s13 = smov (!%p1973_p7, %s2994_s13), 15  ;;  %vm1064_vm2 = vcmask (!%p1769_p10), 25600  }
  0x13   : > { %s1740_s11 = sshll.u32 %s395_s9, 1  ;;  %s2007_s23 = sshll.u32 %s2996_s13, 1 }
  0x14   : > { %s398_s12 = sadd.s32 %s1970_s10, %s1740_s11  ;;  %s429_s25 = sadd.s32 %s2007_s23, %s1970_s10 }
  0x15   : > { %s1742_s14 = sshll.u32 %s398_s12, 3  ;;  %s2998_s22 = smov (!%p404_p8, %s1744_s22), 0 }
  0x16   : > { %s1980_s18 = scalar_lea.vmem %s2972_s0, %s1742_s14  ;;  %s1985_s21 = scalar_lea.vmem %s2979_s7, %s1742_s14 }
  0x17   : > { %v1988_v1 = vld [vmem:[%s1980_s18 + $0x10] sm:$0xff]  ;;  %v1991_v2 = vld [vmem:[%s1980_s18] sm:$0xff]  ;;  %v1998_v3 = vld [vmem:[%s1980_s18 + $0x18] sm:$0xff]  ;;  %s3000_s22 = smov (!%p1745_p9, %s2998_s22), 15  ;;  %s1759_s15 = sshll.u32 %s429_s25, 3 }
  0x18   : > { %476 = vperm.xlu1 %1834, %v1988_v1   ;;  %466 = vperm.xlu0 %1833, %v1991_v2   ;;  %v2001_v4 = vld [vmem:[%s1980_s18 + $0x8] sm:$0xff]  ;;  %v2013_v6 = vld [vmem:[%s1980_s18 + $0x20] sm:$0xff]  ;;  %v2020_v7 = vld [vmem:[%s1980_s18 + $0x38] sm:$0xff]  ;;  %s1750_s8 = sshll.u32 %s3000_s22, 1 }
  0x19   : > { %v2010_v5 = vld [vmem:[%s1980_s18 + $0x28] sm:$0xff]  ;;  %v2023_v8 = vld [vmem:[%s1980_s18 + $0x30] sm:$0xff]  ;;  %v2031_v10 = vld [vmem:[%s1980_s18 + $0x40] sm:$0xff]  ;;  %s412_s9 = sadd.s32 %s1750_s8, %s1970_s10 }
  0x1a   : > { %v2028_v9 = vld [vmem:[%s1980_s18 + $0x48] sm:$0xff]  ;;  %v2036_v11 = vld [vmem:[%s1980_s18 + $0x58] sm:$0xff]  ;;  %v2039_v12 = vld [vmem:[%s1980_s18 + $0x50] sm:$0xff]  ;;  %s1752_s11 = sshll.u32 %s412_s9, 3 }
  0x1b   : > { %v2045_v13 = vld [vmem:[%s1980_s18 + $0x68] sm:$0xff]  ;;  %v2048_v14 = vld [vmem:[%s1980_s18 + $0x60] sm:$0xff]  ;;  %v2053_v15 = vld [vmem:[%s1980_s18 + $0x78] sm:$0xff]  ;;  %s414_s14 = scalar_lea.vmem %s2973_s1, %s1752_s11 }
  0x1c   : > { %481 = vperm.xlu1 %1834, %v1998_v3   ;;  %471 = vperm.xlu0 %1833, %v2001_v4   ;;  %v2056_v16 = vld [vmem:[%s1980_s18 + $0x70] sm:$0xff]  ;;  %v2063_v17 = vld [vmem:[%s414_s14] sm:$0xff]  ;;  %v2089_v20 = vld [vmem:[%s414_s14 + $0x8] sm:$0xff]  ;;  %s431_s18 = scalar_lea.vmem %s2974_s2, %s1759_s15 }
  0x1d   : > { %v2096_v21 = vld [vmem:[%s431_s18] sm:$0xff]  ;;  %v961_v23 = vld [vmem:[%s431_s18 + $0x8] sm:$0xff] }
  0x20   : > { %491 = vperm.xlu1 %1834, %v2010_v5   ;;  %486 = vperm.xlu0 %1833, %v2013_v6  }
  0x24   : > { %501 = vperm.xlu1 %1834, %v2020_v7   ;;  %496 = vperm.xlu0 %1833, %v2023_v8  }
  0x28   : > { %511 = vperm.xlu1 %1834, %v2028_v9   ;;  %506 = vperm.xlu0 %1833, %v2031_v10  }
  0x2c   : > { %521 = vperm.xlu1 %1834, %v2036_v11   ;;  %516 = vperm.xlu0 %1833, %v2039_v12  }
  0x30   : > { %531 = vperm.xlu1 %1834, %v2045_v13   ;;  %526 = vperm.xlu0 %1833, %v2048_v14  }
  0x34   : > { %541 = vperm.xlu1 %1834, %v2053_v15   ;;  %536 = vperm.xlu0 %1833, %v2056_v16  }
  0x38   : > { %1835 = vset.pattern.permute.xlu1 %v1888_v18  ;;  %910 = vperm.xlu0 %1833, %v2063_v17  }
  0x39   : > { %570 = vperm.xlu1 %1835, %v2001_v4  }
  0x3c   : > { %1838 = vset.pattern.permute.xlu0 %v1888_v18 }
  0x3d   : > { %574 = vperm.xlu1 %1835, %v1988_v1   ;;  %566 = vperm.xlu0 %1838, %v1991_v2  }
  0x41   : > { %582 = vperm.xlu1 %1835, %v2013_v6   ;;  %578 = vperm.xlu0 %1838, %v1998_v3  }
  0x45   : > { %590 = vperm.xlu1 %1835, %v2023_v8   ;;  %586 = vperm.xlu0 %1838, %v2010_v5  }
  0x49   : > { %598 = vperm.xlu1 %1835, %v2031_v10   ;;  %594 = vperm.xlu0 %1838, %v2020_v7  }
  0x4d   : > { %606 = vperm.xlu1 %1835, %v2039_v12   ;;  %602 = vperm.xlu0 %1838, %v2028_v9  }
  0x51   : > { %614 = vperm.xlu1 %1835, %v2048_v14   ;;  %610 = vperm.xlu0 %1838, %v2036_v11  }
  0x55   : > { %622 = vperm.xlu1 %1835, %v2056_v16   ;;  %618 = vperm.xlu0 %1838, %v2045_v13  }
  0x59   : > { %1836 = vset.pattern.permute.xlu1 %v1889_v19  ;;  %626 = vperm.xlu0 %1838, %v2053_v15  }
  0x5a   : > { %667 = vperm.xlu1 %1836, %v1991_v2  }
  0x5d   : > { %925 = vperm.xlu0 %1838, %v2089_v20  }
  0x5e   : > { %675 = vperm.xlu1 %1836, %v1988_v1  }
  0x61   : > { %975 = vperm.xlu0 %1838, %v2096_v21  }
  0x62   : > { %679 = vperm.xlu1 %1836, %v1998_v3  }
  0x65   : > { %1842 = vset.pattern.permute.xlu0 %v1889_v19 }
  0x66   : > { %687 = vperm.xlu1 %1836, %v2010_v5   ;;  %671 = vperm.xlu0 %1842, %v2001_v4  }
  0x6a   : > { %695 = vperm.xlu1 %1836, %v2020_v7   ;;  %683 = vperm.xlu0 %1842, %v2013_v6  }
  0x6e   : > { %703 = vperm.xlu1 %1836, %v2028_v9   ;;  %691 = vperm.xlu0 %1842, %v2023_v8  }
  0x72   : > { %711 = vperm.xlu1 %1836, %v2036_v11   ;;  %699 = vperm.xlu0 %1842, %v2031_v10  }
  0x76   : > { %719 = vperm.xlu1 %1836, %v2045_v13   ;;  %707 = vperm.xlu0 %1842, %v2039_v12  }
  0x7a   : > { %727 = vperm.xlu1 %1836, %v2053_v15   ;;  %715 = vperm.xlu0 %1842, %v2048_v14  }
  0x7e   : > { %1837 = vset.pattern.permute.xlu1 %v1890_v22  ;;  %723 = vperm.xlu0 %1842, %v2056_v16  }
  0x7f   : > { %772 = vperm.xlu1 %1837, %v2001_v4  }
  0x82   : > { %933 = vperm.xlu0 %1842, %v2063_v17  }
  0x83   : > { %776 = vperm.xlu1 %1837, %v1988_v1  }
  0x86   : > { %991 = vperm.xlu0 %1842, %v961_v23  }
  0x87   : > { %784 = vperm.xlu1 %1837, %v2013_v6  }
  0x8a   : > { %1845 = vset.pattern.permute.xlu0 %v1890_v22 }
  0x8b   : > { %792 = vperm.xlu1 %1837, %v2023_v8   ;;  %768 = vperm.xlu0 %1845, %v1991_v2  }
  0x8f   : > { %800 = vperm.xlu1 %1837, %v2031_v10   ;;  %780 = vperm.xlu0 %1845, %v1998_v3  }
  0x93   : > { %808 = vperm.xlu1 %1837, %v2039_v12   ;;  %788 = vperm.xlu0 %1845, %v2010_v5  }
  0x97   : > { %v477_v24 = vpop.permute.xlu1 %476  ;;  %816 = vperm.xlu1 %1837, %v2048_v14   ;;  %796 = vperm.xlu0 %1845, %v2020_v7   ;;  %v467_v25 = vpop.permute.xlu0 %466 }
  0x98   : > { %v550_v49 = vmul.f32 %v2157_v42, %v477_v24  ;;  %v548_v50 = vmul.f32 %v2157_v42, %v467_v25 }
  0x9b   : > { %v482_v26 = vpop.permute.xlu1 %481  ;;  %1839 = vset.pattern.permute.xlu1 %v1887_v0  ;;  %804 = vperm.xlu0 %1845, %v2028_v9   ;;  %v472_v27 = vpop.permute.xlu0 %471 }
  0x9c   : > { %915 = vperm.xlu1 %1839, %v2089_v20   ;;  %v549_v44 = vmul.f32 %v2157_v42, %v472_v27  ;;  %v551_v57 = vmul.f32 %v2157_v42, %v482_v26 }
  0x9f   : > { %v492_v28 = vpop.permute.xlu1 %491  ;;  %812 = vperm.xlu0 %1845, %v2036_v11   ;;  %v487_v29 = vpop.permute.xlu0 %486 }
  0xa0   : > { %1840 = vset.pattern.permute.xlu1 %v1888_v18  ;;  %v552_v58 = vmul.f32 %v2157_v42, %v487_v29  ;;  %v553_v1 = vmul.f32 %v2157_v42, %v492_v28  ;;  %v1891_v29 = vmov 0.0  }
  0xa1   : > { %921 = vperm.xlu1 %1840, %v2063_v17   ;;  %1015 = vst.msk [vmem:[#allocation2] sm:$0x1] %vm1014_vm0, %v1891_v29  ;;  %1016 = vst.msk [vmem:[#allocation2 + $0x18] sm:$0x1] %vm1014_vm0, %v1891_v29 }
  0xa2   : > { %1017 = vst.msk [vmem:[#allocation2 + $0x30] sm:$0x1] %vm1014_vm0, %v1891_v29  ;;  %1018 = vst.msk [vmem:[#allocation2 + $0x48] sm:$0x1] %vm1014_vm0, %v1891_v29 }
  0xa3   : > { %v502_v30 = vpop.permute.xlu1 %501  ;;  %824 = vperm.xlu0 %1845, %v2056_v16   ;;  %v497_v31 = vpop.permute.xlu0 %496  ;;  %1019 = vst.msk [vmem:[#allocation2 + $0x60] sm:$0x1] %vm1014_vm0, %v1891_v29  ;;  %1020 = vst.msk [vmem:[#allocation2 + $0x78] sm:$0x1] %vm1014_vm0, %v1891_v29 }
  0xa4   : > { %v554_v2 = vmul.f32 %v2157_v42, %v497_v31  ;;  %v555_v9 = vmul.f32 %v2157_v42, %v502_v30  ;;  %1021 = vst.msk [vmem:[#allocation2 + $0x90] sm:$0x1] %vm1014_vm0, %v1891_v29  ;;  %1022 = vst.msk [vmem:[#allocation2 + $0xa8] sm:$0x1] %vm1014_vm0, %v1891_v29 }
  0xa5   : > { %1841 = vset.pattern.permute.xlu1 %v1887_v0  ;;  %1023 = vst.msk [vmem:[#allocation2 + $0xc0] sm:$0x1] %vm1014_vm0, %v1891_v29  ;;  %1024 = vst.msk [vmem:[#allocation2 + $0xd8] sm:$0x1] %vm1014_vm0, %v1891_v29 }
  0xa6   : > { %964 = vperm.xlu1 %1841, %v2096_v21   ;;  %1025 = vst.msk [vmem:[#allocation2 + $0x11] sm:$0x1] %vm1014_vm0, %v1891_v29  ;;  %1026 = vst.msk [vmem:[#allocation2 + $0x29] sm:$0x1] %vm1014_vm0, %v1891_v29 }
  0xa7   : > { %v512_v32 = vpop.permute.xlu1 %511  ;;  %949 = vperm.xlu0 %1845, %v2089_v20   ;;  %v507_v33 = vpop.permute.xlu0 %506  ;;  %1027 = vst.msk [vmem:[#allocation2 + $0x41] sm:$0x1] %vm1014_vm0, %v1891_v29  ;;  %1028 = vst.msk [vmem:[#allocation2 + $0x59] sm:$0x1] %vm1014_vm0, %v1891_v29 }
  0xa8   : > { %v556_v10 = vmul.f32 %v2157_v42, %v507_v33  ;;  %1029 = vst.msk [vmem:[#allocation2 + $0x71] sm:$0x1] %vm1014_vm0, %v1891_v29  ;;  %1030 = vst.msk [vmem:[#allocation2 + $0x89] sm:$0x1] %vm1014_vm0, %v1891_v29 }
  0xa9   : > { %1031 = vst.msk [vmem:[#allocation2 + $0xa1] sm:$0x1] %vm1014_vm0, %v1891_v29  ;;  %1032 = vst.msk [vmem:[#allocation2 + $0xb9] sm:$0x1] %vm1014_vm0, %v1891_v29 }
  0xaa   : > { %969 = vperm.xlu1 %1841, %v961_v23   ;;  %1033 = vst.msk [vmem:[#allocation2 + $0xd1] sm:$0x1] %vm1014_vm0, %v1891_v29  ;;  %1034 = vst.msk [vmem:[#allocation2 + $0xe9] sm:$0x1] %vm1014_vm0, %v1891_v29 }
  0xab   : > { %v2136_v34 = vpop.permute.xlu1 %521  ;;  %1003 = vperm.xlu0 %1845, %v961_v23   ;;  %v517_v35 = vpop.permute.xlu0 %516 }
  0xac   : > { %v559_v25 = vmul.f32 %v2157_v42, %v2136_v34 }
  0xae   : > { %1843 = vset.pattern.permute.xlu1 %v1888_v18  ;;  %v558_v18 = vmul.f32 %v2157_v42, %v517_v35 }
  0xaf   : > { %v2139_v36 = vpop.permute.xlu1 %531  ;;  %979 = vperm.xlu1 %1843, %v961_v23   ;;  %v527_v37 = vpop.permute.xlu0 %526 }
  0xb0   : > { %v560_v26 = vmul.f32 %v2157_v42, %v527_v37  ;;  %v561_v34 = vmul.f32 %v2157_v42, %v2139_v36 }
  0xb3   : > { %v2141_v38 = vpop.permute.xlu1 %541  ;;  %1844 = vset.pattern.permute.xlu1 %v1889_v19  ;;  %v2144_v39 = vpop.permute.xlu0 %536 }
  0xb4   : > { %937 = vperm.xlu1 %1844, %v2089_v20   ;;  %v562_v35 = vmul.f32 %v2157_v42, %v2144_v39 }
  0xb7   : > { %v2152_v41 = vpop.permute.xlu0 %910 }
  0xb8   : > { %v571_v43 = vpop.permute.xlu1 %570  ;;  %987 = vperm.xlu1 %1844, %v2096_v21  }
  0xb9   : > { %v634_v45 = vmul.f32 %v2150_v40, %v571_v43 }
  0xbb   : > { %v2162_v46 = vadd.f32 %v634_v45, %v549_v44 }
  0xbc   : > { %v575_v47 = vpop.permute.xlu1 %574  ;;  %1846 = vset.pattern.permute.xlu1 %v1890_v22  ;;  %v567_v48 = vpop.permute.xlu0 %566 }
  0xbd   : > { %v635_v51 = vmul.f32 %v2150_v40, %v575_v47  ;;  %v633_v52 = vmul.f32 %v2150_v40, %v567_v48  ;;  %820 = vperm.xlu1 %1846, %v2045_v13   ;;  %v563_v48 = vmul.f32 %v2157_v42, %v2141_v38 }
  0xbf   : > { %v2169_v53 = vadd.f32 %v635_v51, %v550_v49  ;;  %v2171_v54 = vadd.f32 %v633_v52, %v548_v50 }
  0xc0   : > { %v583_v55 = vpop.permute.xlu1 %582  ;;  %v579_v56 = vpop.permute.xlu0 %578 }
  0xc1   : > { %v637_v59 = vmul.f32 %v2150_v40, %v583_v55  ;;  %v636_v60 = vmul.f32 %v2150_v40, %v579_v56  ;;  %828 = vperm.xlu1 %1846, %v2053_v15  }
  0xc3   : > { %v2178_v61 = vadd.f32 %v637_v59, %v552_v58  ;;  %v2180_v62 = vadd.f32 %v636_v60, %v551_v57 }
  0xc4   : > { %v591_v63 = vpop.permute.xlu1 %590  ;;  %v587_v0 = vpop.permute.xlu0 %586 }
  0xc5   : > { %v639_v3 = vmul.f32 %v2150_v40, %v591_v63  ;;  %v638_v4 = vmul.f32 %v2150_v40, %v587_v0  ;;  %945 = vperm.xlu1 %1846, %v2063_v17   ;;  %v557_v17 = vmul.f32 %v2157_v42, %v512_v32 }
  0xc7   : > { %v2187_v5 = vadd.f32 %v639_v3, %v554_v2  ;;  %v2189_v6 = vadd.f32 %v638_v4, %v553_v1  ;;  %v2261_v1 = vld [vmem:[%s2975_s3 + $0x2] ss:$0 sm:$0xff] }
  0xc8   : > { %v599_v7 = vpop.permute.xlu1 %598  ;;  %v595_v8 = vpop.permute.xlu0 %594 }
  0xc9   : > { %v641_v11 = vmul.f32 %v2150_v40, %v599_v7  ;;  %v640_v12 = vmul.f32 %v2150_v40, %v595_v8  ;;  %999 = vperm.xlu1 %1846, %v2096_v21  }
  0xcb   : > { %v2196_v13 = vadd.f32 %v641_v11, %v556_v10  ;;  %v2198_v14 = vadd.f32 %v640_v12, %v555_v9 }
  0xcc   : > { %v607_v15 = vpop.permute.xlu1 %606  ;;  %v603_v16 = vpop.permute.xlu0 %602 }
  0xcd   : > { %v643_v19 = vmul.f32 %v2150_v40, %v607_v15  ;;  %v642_v20 = vmul.f32 %v2150_v40, %v603_v16  ;;  %v2273_v15 = vld [vmem:[%s2975_s3 + $0x3] ss:$0 sm:$0xff] }
  0xcf   : > { %v2204_v22 = vadd.f32 %v643_v19, %v558_v18  ;;  %v2206_v23 = vadd.f32 %v642_v20, %v557_v17 }
  0xd0   : > { %v615_v24 = vpop.permute.xlu1 %614  ;;  %v611_v21 = vpop.permute.xlu0 %610 }
  0xd1   : > { %v645_v27 = vmul.f32 %v2150_v40, %v615_v24  ;;  %v644_v28 = vmul.f32 %v2150_v40, %v611_v21  ;;  %v2283_v24 = vld [vmem:[%s2976_s4] ss:$0 sm:$0xff] }
  0xd3   : > { %v2233_v30 = vadd.f32 %v645_v27, %v560_v26  ;;  %v2235_v31 = vadd.f32 %v644_v28, %v559_v25 }
  0xd4   : > { %v623_v32 = vpop.permute.xlu1 %622  ;;  %v619_v33 = vpop.permute.xlu0 %618 }
  0xd5   : > { %v647_v37 = vmul.f32 %v2150_v40, %v623_v32  ;;  %v646_v43 = vmul.f32 %v2150_v40, %v619_v33 }
  0xd7   : > { %v2243_v44 = vadd.f32 %v647_v37, %v562_v35  ;;  %v662_v45 = vadd.f32 %v646_v43, %v561_v34 }
  0xd8   : > { %v627_v47 = vpop.permute.xlu0 %626 }
  0xd9   : > { %v648_v49 = vmul.f32 %v2150_v40, %v627_v47  ;;  %v668_v50 = vpop.permute.xlu1 %667 }
  0xda   : > { %v734_v35 = vmul.f32 %v2261_v1, %v668_v50 }
  0xdb   : > { %v664_v51 = vadd.f32 %v648_v49, %v563_v48 }
  0xdc   : > { %v2248_v52 = vpop.permute.xlu0 %925 }
  0xdd   : > { %v676_v36 = vpop.permute.xlu1 %675 }
  0xde   : > { %v736_v18 = vmul.f32 %v2261_v1, %v676_v36 }
  0xe0   : > { %v2250_v55 = vpop.permute.xlu0 %975  ;;  %v752_v27 = vadd.f32 %v736_v18, %v2169_v53 }
  0xe1   : > { %v680_v39 = vpop.permute.xlu1 %679 }
  0xe2   : > { %v737_v50 = vmul.f32 %v2261_v1, %v680_v39 }
  0xe5   : > { %v688_v56 = vpop.permute.xlu1 %687  ;;  %v672_v57 = vpop.permute.xlu0 %671 }
  0xe6   : > { %v735_v11 = vmul.f32 %v2261_v1, %v672_v57 }
  0xe8   : > { %v751_v19 = vadd.f32 %v735_v11, %v2162_v46 }
  0xe9   : > { %v2252_v58 = vpop.permute.xlu1 %695  ;;  %v684_v59 = vpop.permute.xlu0 %683 }
  0xea   : > { %v738_v28 = vmul.f32 %v2261_v1, %v684_v59 }
  0xec   : > { %v754_v43 = vadd.f32 %v738_v28, %v2178_v61  ;;  %v741_v28 = vmul.f32 %v2261_v1, %v2252_v58 }
  0xed   : > { %v2254_v60 = vpop.permute.xlu1 %703  ;;  %v692_v63 = vpop.permute.xlu0 %691 }
  0xee   : > { %v740_v53 = vmul.f32 %v2261_v1, %v692_v63 }
  0xf0   : > { %v756_v59 = vadd.f32 %v740_v53, %v2187_v5 }
  0xf1   : > { %v2256_v0 = vpop.permute.xlu1 %711  ;;  %v700_v38 = vpop.permute.xlu0 %699 }
  0xf2   : > { %v742_v61 = vmul.f32 %v2261_v1, %v700_v38  ;;  %v753_v38 = vadd.f32 %v737_v50, %v2180_v62  ;;  %v743_v50 = vmul.f32 %v2261_v1, %v2254_v60 }
  0xf4   : > { %v758_v5 = vadd.f32 %v742_v61, %v2196_v13 }
  0xf5   : > { %v720_v2 = vpop.permute.xlu1 %719  ;;  %v708_v3 = vpop.permute.xlu0 %707 }
  0xf6   : > { %v747_v4 = vmul.f32 %v2261_v1, %v720_v2  ;;  %v744_v11 = vmul.f32 %v2261_v1, %v708_v3 }
  0xf8   : > { %v2264_v7 = vadd.f32 %v747_v4, %v662_v45 }
  0xf9   : > { %v728_v8 = vpop.permute.xlu1 %727  ;;  %v716_v9 = vpop.permute.xlu0 %715 }
  0xfa   : > { %v749_v10 = vmul.f32 %v2261_v1, %v728_v8 }
  0xfc   : > { %v2268_v12 = vadd.f32 %v749_v10, %v664_v51  ;;  %v750_v51 = vadd.f32 %v734_v35, %v2171_v54  ;;  %v739_v10 = vmul.f32 %v2261_v1, %v688_v56 }
  0xfd   : > { %v2275_v16 = vpop.permute.xlu0 %723 }
  0xfe   : > { %v773_v17 = vpop.permute.xlu1 %772 }
  0xff   : > { %v836_v20 = vmul.f32 %v2273_v15, %v773_v17 }
 0x101   : > { %v852_v21 = vadd.f32 %v836_v20, %v751_v19  ;;  %v2285_v25 = vpop.permute.xlu0 %933 }
 0x102   : > { %v777_v26 = vpop.permute.xlu1 %776 }
 0x103   : > { %v2290_v29 = vadd.f32 %v2283_v24, %v852_v21  ;;  %v837_v46 = vmul.f32 %v2273_v15, %v777_v26 }
 0x105   : > { %v891_v32 = vmax.f32 %v2290_v29, 0.0  ;;  %v853_v33 = vadd.f32 %v837_v46, %v752_v27  ;;  %v2294_v34 = vpop.permute.xlu0 %991  ;;  %v755_v27 = vadd.f32 %v739_v10, %v2189_v6  ;;  %v760_v46 = vadd.f32 %v744_v11, %v2204_v22 }
 0x106   : > { %v785_v37 = vpop.permute.xlu1 %784 }
 0x107   : > { %1038 = vst.msk [vmem:[#allocation2 + $0x21] sm:$0xff] %vm1036_vm1, %v891_v32  ;;  %v2303_v45 = vadd.f32 %v2283_v24, %v853_v33  ;;  %v839_v47 = vmul.f32 %v2273_v15, %v785_v37  ;;  %v746_v33 = vmul.f32 %v2261_v1, %v716_v9 }
 0x109   : > { %v892_v48 = vmax.f32 %v2303_v45, 0.0  ;;  %v855_v49 = vadd.f32 %v839_v47, %v754_v43  ;;  %v762_v61 = vadd.f32 %v746_v33, %v2233_v30 }
 0x10a   : > { %v793_v36 = vpop.permute.xlu1 %792  ;;  %v769_v57 = vpop.permute.xlu0 %768 }
 0x10b   : > { %1039 = vst.msk [vmem:[#allocation2 + $0x31] sm:$0xff] %vm1036_vm1, %v892_v48  ;;  %v2315_v63 = vadd.f32 %v2283_v24, %v855_v49  ;;  %v841_v2 = vmul.f32 %v2273_v15, %v793_v36  ;;  %v835_v4 = vmul.f32 %v2273_v15, %v769_v57 }
 0x10d   : > { %v894_v54 = vmax.f32 %v2315_v63, 0.0  ;;  %v857_v39 = vadd.f32 %v841_v2, %v756_v59  ;;  %v851_v8 = vadd.f32 %v835_v4, %v750_v51  ;;  %v757_v51 = vadd.f32 %v741_v28, %v2198_v14 }
 0x10e   : > { %v801_v17 = vpop.permute.xlu1 %800  ;;  %v781_v18 = vpop.permute.xlu0 %780 }
 0x10f   : > { %1041 = vst.msk [vmem:[#allocation2 + $0x49] sm:$0xff] %vm1036_vm1, %v894_v54  ;;  %v2328_v19 = vadd.f32 %v2283_v24, %v857_v39  ;;  %v2331_v20 = vadd.f32 %v2283_v24, %v851_v8  ;;  %v843_v62 = vmul.f32 %v2273_v15, %v801_v17  ;;  %v838_v56 = vmul.f32 %v2273_v15, %v781_v18 }
 0x111   : > { %v896_v13 = vmax.f32 %v2328_v19, 0.0  ;;  %v890_v3 = vmax.f32 %v2331_v20, 0.0  ;;  %v859_v21 = vadd.f32 %v843_v62, %v758_v5  ;;  %v854_v26 = vadd.f32 %v838_v56, %v753_v38 }
 0x112   : > { %v809_v35 = vpop.permute.xlu1 %808  ;;  %v789_v37 = vpop.permute.xlu0 %788  ;;  %v759_v38 = vadd.f32 %v743_v50, %v2206_v23  ;;  %v745_v5 = vmul.f32 %v2261_v1, %v2256_v0 }
 0x113   : > { %1043 = vst.msk [vmem:[#allocation2 + $0x61] sm:$0xff] %vm1036_vm1, %v896_v13  ;;  %1037 = vst.msk [vmem:[#allocation2 + $0x19] sm:$0xff] %vm1036_vm1, %v890_v3  ;;  %v2349_v43 = vadd.f32 %v2283_v24, %v859_v21  ;;  %v2352_v6 = vadd.f32 %v2283_v24, %v854_v26  ;;  %v845_v22 = vmul.f32 %v2273_v15, %v809_v35 }
 0x114   : > { %v840_v58 = vmul.f32 %v2273_v15, %v789_v37  ;;  %v748_v21 = vmul.f32 %v2261_v1, %v2275_v16  ;;  %v918_v16 = vmul.f32 %v2157_v42, %v2152_v41 }
 0x115   : > { %v898_v9 = vmax.f32 %v2349_v43, 0.0  ;;  %v893_v53 = vmax.f32 %v2352_v6, 0.0  ;;  %v861_v47 = vadd.f32 %v845_v22, %v760_v46 }
 0x116   : > { %v856_v49 = vadd.f32 %v840_v58, %v755_v27  ;;  %v817_v36 = vpop.permute.xlu1 %816  ;;  %v797_v57 = vpop.permute.xlu0 %796  ;;  %v761_v27 = vadd.f32 %v745_v5, %v2235_v31  ;;  %v764_v22 = vadd.f32 %v748_v21, %v2243_v44  ;;  %v929_v21 = vmul.f32 %v2150_v40, %v2248_v52 }
 0x117   : > { %1045 = vst.msk [vmem:[#allocation2 + $0x79] sm:$0xff] %vm1036_vm1, %v898_v9  ;;  %1040 = vst.msk [vmem:[#allocation2 + $0x39] sm:$0xff] %vm1036_vm1, %v893_v53  ;;  %v2369_v59 = vadd.f32 %v2283_v24, %v861_v47  ;;  %v847_v60 = vmul.f32 %v2273_v15, %v817_v36  ;;  %v842_v30 = vmul.f32 %v2273_v15, %v797_v57 }
 0x118   : > { %v2372_v14 = vadd.f32 %v2283_v24, %v856_v49  ;;  %v940_v47 = vmul.f32 %v2261_v1, %v2285_v25 }
 0x119   : > { %v900_v2 = vmax.f32 %v2369_v59, 0.0  ;;  %v863_v39 = vadd.f32 %v847_v60, %v762_v61  ;;  %v858_v8 = vadd.f32 %v842_v30, %v757_v51 }
 0x11a   : > { %v895_v4 = vmax.f32 %v2372_v14, 0.0  ;;  %v805_v10 = vpop.permute.xlu0 %804 }
 0x11b   : > { %1047 = vst.msk [vmem:[#allocation2 + $0x91] sm:$0xff] %vm1036_vm1, %v900_v2  ;;  %v2388_v11 = vadd.f32 %v2283_v24, %v863_v39  ;;  %v2391_v17 = vadd.f32 %v2283_v24, %v858_v8  ;;  %v844_v23 = vmul.f32 %v2273_v15, %v805_v10  ;;  %v916_v18 = vpop.permute.xlu1 %915 }
 0x11c   : > { %1042 = vst.msk [vmem:[#allocation2 + $0x51] sm:$0xff] %vm1036_vm1, %v895_v4  ;;  %v919_v10 = vmul.f32 %v2157_v42, %v916_v18 }
 0x11d   : > { %v902_v62 = vmax.f32 %v2388_v11, 0.0  ;;  %v897_v0 = vmax.f32 %v2391_v17, 0.0  ;;  %v860_v56 = vadd.f32 %v844_v23, %v759_v38  ;;  %v995_v23 = vmul.f32 %v2261_v1, %v2294_v34 }
 0x11e   : > { %v813_v26 = vpop.permute.xlu0 %812 }
 0x11f   : > { %1049 = vst.msk [vmem:[#allocation2 + $0xa9] sm:$0xff] %vm1036_vm1, %v902_v62  ;;  %1044 = vst.msk [vmem:[#allocation2 + $0x69] sm:$0xff] %vm1036_vm1, %v897_v0  ;;  %v2406_v28 = vadd.f32 %v2283_v24, %v860_v56  ;;  %v846_v46 = vmul.f32 %v2273_v15, %v813_v26 }
 0x120   : > { %v922_v33 = vpop.permute.xlu1 %921 }
 0x121   : > { %v899_v35 = vmax.f32 %v2406_v28, 0.0  ;;  %v862_v31 = vadd.f32 %v846_v46, %v761_v27  ;;  %v928_v37 = vmul.f32 %v2150_v40, %v922_v33  ;;  %v931_v33 = vadd.f32 %v929_v21, %v919_v10 }
 0x122   : > { %v825_v58 = vpop.permute.xlu0 %824 }
 0x123   : > { %1046 = vst.msk [vmem:[#allocation2 + $0x81] sm:$0xff] %vm1036_vm1, %v899_v35  ;;  %v2420_v49 = vadd.f32 %v2283_v24, %v862_v31  ;;  %v930_v51 = vadd.f32 %v928_v37, %v918_v16  ;;  %v849_v41 = vmul.f32 %v2273_v15, %v825_v58 }
 0x125   : > { %v901_v50 = vmax.f32 %v2420_v49, 0.0  ;;  %v865_v61 = vadd.f32 %v849_v41, %v764_v22  ;;  %v965_v36 = vpop.permute.xlu1 %964  ;;  %v942_v57 = vadd.f32 %v940_v47, %v930_v51 }
 0x126   : > { %v950_v30 = vpop.permute.xlu0 %949 }
 0x127   : > { %1048 = vst.msk [vmem:[#allocation2 + $0x99] sm:$0xff] %vm1036_vm1, %v901_v50  ;;  %v2428_v44 = vadd.f32 %v2283_v24, %v865_v61  ;;  %v953_v37 = vmul.f32 %v2273_v15, %v950_v30 }
 0x129   : > { %v904_v25 = vmax.f32 %v2428_v44, 0.0  ;;  %v970_v60 = vpop.permute.xlu1 %969 }
 0x12a   : > { %v973_v8 = vmul.f32 %v2157_v42, %v970_v60  ;;  %v1004_v5 = vpop.permute.xlu0 %1003 }
 0x12b   : > { %1051 = vst.msk [vmem:[#allocation2 + $0xc1] sm:$0xff] %vm1036_vm1, %v904_v25  ;;  %v1007_v26 = vmul.f32 %v2273_v15, %v1004_v5 }
 0x12e   : > { %v980_v39 = vpop.permute.xlu1 %979 }
 0x12f   : > { %v983_v38 = vmul.f32 %v2150_v40, %v980_v39 }
 0x131   : > { %v985_v56 = vadd.f32 %v983_v38, %v973_v8  ;;  %v972_v38 = vmul.f32 %v2157_v42, %v965_v36 }
 0x133   : > { %v997_v27 = vadd.f32 %v995_v23, %v985_v56  ;;  %v938_v46 = vpop.permute.xlu1 %937  ;;  %v982_v56 = vmul.f32 %v2150_v40, %v2250_v55 }
 0x134   : > { %v941_v16 = vmul.f32 %v2261_v1, %v938_v46 }
 0x135   : > { %v1009_v31 = vadd.f32 %v1007_v26, %v997_v27  ;;  %v984_v27 = vadd.f32 %v982_v56, %v972_v38 }
 0x136   : > { %v943_v22 = vadd.f32 %v941_v16, %v931_v33 }
 0x137   : > { %v1011_v18 = vadd.f32 %v2283_v24, %v1009_v31  ;;  %v988_v58 = vpop.permute.xlu1 %987 }
 0x138   : > { %v955_v47 = vadd.f32 %v953_v37, %v943_v22  ;;  %v994_v21 = vmul.f32 %v2261_v1, %v988_v58 }
 0x139   : > { %v1013_v34 = vmax.f32 %v1011_v18, 0.0 }
 0x13a   : > { %v957_v51 = vadd.f32 %v2283_v24, %v955_v47  ;;  %v996_v42 = vadd.f32 %v994_v21, %v984_v27 }
 0x13b   : > { %1057 = vst.msk [vmem:[#allocation2 + $0xe1] sm:$0xff] %vm1036_vm1, %v1013_v34 }
 0x13c   : > { %v959_v52 = vmax.f32 %v957_v51, 0.0  ;;  %v821_v41 = vpop.permute.xlu1 %820 }
 0x13d   : > { %v848_v61 = vmul.f32 %v2273_v15, %v821_v41 }
 0x13e   : > { %1054 = vst.msk [vmem:[#allocation2 + $0x9] sm:$0xff] %vm1036_vm1, %v959_v52 }
 0x13f   : > { %v864_v60 = vadd.f32 %v848_v61, %v2264_v7 }
 0x140   : > { %v829_v39 = vpop.permute.xlu1 %828 }
 0x141   : > { %v887_v30 = vadd.f32 %v2283_v24, %v864_v60  ;;  %v850_v8 = vmul.f32 %v2273_v15, %v829_v39 }
 0x143   : > { %v903_v10 = vmax.f32 %v887_v30, 0.0  ;;  %v866_v5 = vadd.f32 %v850_v8, %v2268_v12 }
 0x144   : > { %v946_v23 = vpop.permute.xlu1 %945 }
 0x145   : > { %1050 = vst.msk [vmem:[#allocation2 + $0xb1] sm:$0xff] %vm1036_vm1, %v903_v10  ;;  %v889_v7 = vadd.f32 %v2283_v24, %v866_v5  ;;  %v952_v26 = vmul.f32 %v2273_v15, %v946_v23 }
 0x147   : > { %v905_v46 = vmax.f32 %v889_v7, 0.0  ;;  %v954_v33 = vadd.f32 %v952_v26, %v942_v57  ;;  %v1892_v57 = vmov (!%p1769_p10), 0.0  }
 0x148   : > { %v1000_v16 = vpop.permute.xlu1 %999  ;;  %1065 = vst.msk [vmem:[#allocation2 + $0x10] sm:$0x3] (!%p1769_p10), %vm1064_vm2, %v1892_v57 }
 0x149   : > { %1052 = vst.msk [vmem:[#allocation2 + $0xc9] sm:$0xff] %vm1036_vm1, %v905_v46  ;;  %v956_v12 = vadd.f32 %v2283_v24, %v954_v33  ;;  %v1006_v36 = vmul.f32 %v2273_v15, %v1000_v16 }
 0x14b   : > { %v958_v40 = vmax.f32 %v956_v12, 0.0  ;;  %v1008_v55 = vadd.f32 %v1006_v36, %v996_v42  ;;  %1061 = sbr.rel (%p1769_p10) target bundleno = 338 (0x152), region = 52 }
 0x14d   : > { %1053 = vst.msk [vmem:[#allocation2 + $0x1] sm:$0xff] %vm1036_vm1, %v958_v40  ;;  %v1010_v1 = vadd.f32 %v2283_v24, %v1008_v55 }
 0x14e   : > { %1062 = vst.msk [vmem:[#allocation2] sm:$0xff] (!%p1769_p10), %vm1036_vm1, %v1892_v57  ;;  %1063 = vst.msk [vmem:[#allocation2 + $0x8] sm:$0xff] (!%p1769_p10), %vm1036_vm1, %v1892_v57 }
 0x14f   : > { %v1012_v31 = vmax.f32 %v1010_v1, 0.0 }
 0x151   : > { %1056 = vst.msk [vmem:[#allocation2 + $0xd9] sm:$0xff] %vm1036_vm1, %v1012_v31 }
 0x152 PF: > { %p1770_p11 = scmp.ne.s32.totalorder %s1869_s24, 1 }
 0x153   : > { %vm1072_vm3 = vcmask (!%p1770_p11), 25600   ;;  %v1893_v15 = vmov (!%p1770_p11), 0.0  }
 0x154   : > { %1069 = sbr.rel (%p1770_p11) target bundleno = 347 (0x15b), region = 56  ;;  %1070 = vst.msk [vmem:[#allocation2 + $0xd8] sm:$0xff] (!%p1770_p11), %vm1036_vm1, %v1893_v15  ;;  %1071 = vst.msk [vmem:[#allocation2 + $0xe0] sm:$0xff] (!%p1770_p11), %vm1036_vm1, %v1893_v15 }
 0x155   : > { %1073 = vst.msk [vmem:[#allocation2 + $0xe8] sm:$0x3] (!%p1770_p11), %vm1072_vm3, %v1893_v15 }
 0x15b PF: > { %v1076_v24 = vld [vmem:[#allocation2 + $0x18] sm:$0xff]  ;;  %v1078_v37 = vld [vmem:[#allocation2 + $0x30] sm:$0xff]  ;;  %v1080_v22 = vld [vmem:[#allocation2 + $0x48] sm:$0xff]  ;;  %1492 = vst.msk [vmem:[%s1985_s21 + $0x10] sm:$0xff] %vm1036_vm1, %v892_v48  ;;  %s1894_s15 = smov 4   ;;  %vm1570_vm4 = vcmask 64544  }
 0x15c   : > { %1490 = vst.msk [vmem:[%s1985_s21] sm:$0xff] %vm1036_vm1, %v890_v3  ;;  %1493 = vst.msk [vmem:[%s1985_s21 + $0x18] sm:$0xff] %vm1036_vm1, %v893_v53  ;;  %v2535_v29 = vld [vmem:[%s2977_s5] ss:$0 sm:$0xff]  ;;  %v2545_v45 = vld [vmem:[%s2977_s5 + $0x6] ss:$0 sm:$0xff] }
 0x15d   : > { %1491 = vst.msk [vmem:[%s1985_s21 + $0x8] sm:$0xff] %vm1036_vm1, %v891_v32  ;;  %1495 = vst.msk [vmem:[%s1985_s21 + $0x28] sm:$0xff] %vm1036_vm1, %v895_v4  ;;  %v2540_v32 = vld [vmem:[%s2977_s5 + $0x3] ss:$0 sm:$0xff]  ;;  %v1101_v48 = vmul.f32 %v2535_v29, %v1076_v24  ;;  %v1191_v19 = vld [vmem:[#allocation2 + $0x19] sm:$0xff]  ;;  %v2598_v44 = vmul.f32 %v2535_v29, %v1080_v22 }
 0x15e   : > { %1494 = vst.msk [vmem:[%s1985_s21 + $0x20] sm:$0xff] %vm1036_vm1, %v894_v54  ;;  %1497 = vst.msk [vmem:[%s1985_s21 + $0x38] sm:$0xff] %vm1036_vm1, %v897_v0  ;;  %v1122_v63 = vmul.f32 %v2540_v32, %v1078_v37  ;;  %v1159_v54 = vmul.f32 %v2545_v45, %v1080_v22  ;;  %v2550_v20 = vld [vmem:[#allocation2 + $0x31] sm:$0xff]  ;;  %v2557_v3 = vld [vmem:[%s2977_s5 + $0x1] ss:$0 sm:$0xff]  ;;  %v1124_v53 = vmul.f32 %v2540_v32, %v1080_v22 }
 0x15f   : > { %1496 = vst.msk [vmem:[%s1985_s21 + $0x30] sm:$0xff] %vm1036_vm1, %v896_v13  ;;  %1499 = vst.msk [vmem:[%s1985_s21 + $0x48] sm:$0xff] %vm1036_vm1, %v899_v35  ;;  %v2552_v13 = vld [vmem:[#allocation2 + $0x49] sm:$0xff]  ;;  %v2562_v43 = vld [vmem:[%s2977_s5 + $0x4] ss:$0 sm:$0xff]  ;;  %v1216_v14 = vmul.f32 %v2557_v3, %v1191_v19  ;;  %v1120_v17 = vmul.f32 %v2540_v32, %v1076_v24 }
 0x160   : > { %1498 = vst.msk [vmem:[%s1985_s21 + $0x40] sm:$0xff] %vm1036_vm1, %v898_v9  ;;  %1501 = vst.msk [vmem:[%s1985_s21 + $0x58] sm:$0xff] %vm1036_vm1, %v901_v50  ;;  %v2567_v6 = vld [vmem:[%s2977_s5 + $0x7] ss:$0 sm:$0xff]  ;;  %v1103_v9 = vmul.f32 %v2535_v29, %v1078_v37  ;;  %v1138_v59 = vadd.f32 %v1122_v63, %v1101_v48  ;;  %v2572_v4 = vld [vmem:[#allocation2 + $0x32] sm:$0xff]  ;;  %v1157_v50 = vmul.f32 %v2545_v45, %v1078_v37 }
 0x161   : > { %1500 = vst.msk [vmem:[%s1985_s21 + $0x50] sm:$0xff] %vm1036_vm1, %v900_v2  ;;  %1503 = vst.msk [vmem:[%s1985_s21 + $0x68] sm:$0xff] %vm1036_vm1, %v903_v10  ;;  %v1322_v2 = vld [vmem:[#allocation2 + $0x1a] sm:$0xff]  ;;  %v2574_v11 = vld [vmem:[#allocation2 + $0x4a] sm:$0xff]  ;;  %v1290_v0 = vmul.f32 %v2567_v6, %v2552_v13  ;;  %v1251_v47 = vmul.f32 %v2562_v43, %v1191_v19  ;;  %v1288_v34 = vmul.f32 %v2567_v6, %v2550_v20 }
 0x162   : > { %1502 = vst.msk [vmem:[%s1985_s21 + $0x60] sm:$0xff] %vm1036_vm1, %v902_v62  ;;  %1505 = vst.msk [vmem:[%s1985_s21 + $0x78] sm:$0xff] %vm1036_vm1, %v905_v46  ;;  %v1253_v62 = vmul.f32 %v2562_v43, %v2550_v20  ;;  %v2584_v28 = vld [vmem:[%s2977_s5 + $0x2] ss:$0 sm:$0xff]  ;;  %v2589_v35 = vld [vmem:[%s2977_s5 + $0x5] ss:$0 sm:$0xff]  ;;  %v2603_v51 = vadd.f32 %v1124_v53, %v1103_v9 }
 0x163   : > { %1504 = vst.msk [vmem:[%s1985_s21 + $0x70] sm:$0xff] %vm1036_vm1, %v904_v25  ;;  %v2594_v49 = vld [vmem:[%s2977_s5 + $0x8] ss:$0 sm:$0xff]  ;;  %v1175_v25 = vadd.f32 %v1159_v54, %v1138_v59  ;;  %v1074_v18 = vld [vmem:[#allocation2] sm:$0xff]  ;;  %v1347_v52 = vmul.f32 %v2584_v28, %v1322_v2  ;;  %v1384_v41 = vmul.f32 %v2589_v35, %v2572_v4  ;;  %v1079_v8 = vld [vmem:[#allocation2 + $0x38] sm:$0xff]  ;;  %v2613_v5 = vmul.f32 %v2589_v35, %v1322_v2 }
 0x164   : > { %v1189_v58 = vld [vmem:[#allocation2 + $0x1] sm:$0xff]  ;;  %v1421_v61 = vmul.f32 %v2594_v49, %v2574_v11  ;;  %v1099_v60 = vmul.f32 %v2535_v29, %v1074_v18  ;;  %v2615_v23 = vld [vmem:[#allocation2 + $0x50] sm:$0xff]  ;;  %v1194_v7 = vld [vmem:[#allocation2 + $0x39] sm:$0xff]  ;;  %v1123_v46 = vmul.f32 %v2540_v32, %v1079_v8  ;;  %v1419_v36 = vmul.f32 %v2594_v49, %v2572_v4 }
 0x165   : > { %v1320_v39 = vld [vmem:[#allocation2 + $0x2] sm:$0xff]  ;;  %v1232_v38 = vadd.f32 %v1216_v14, %v1175_v25  ;;  %v1214_v10 = vmul.f32 %v2557_v3, %v1189_v58  ;;  %v1160_v33 = vmul.f32 %v2545_v45, %v2615_v23  ;;  %v2622_v16 = vld [vmem:[#allocation2 + $0x51] sm:$0xff]  ;;  %v1254_v55 = vmul.f32 %v2562_v43, %v1194_v7  ;;  %v1325_v1 = vld [vmem:[#allocation2 + $0x3a] sm:$0xff] }
 0x166   : > { %v1077_v30 = vld [vmem:[#allocation2 + $0x20] sm:$0xff]  ;;  %v1136_v26 = vadd.f32 %v1120_v17, %v1099_v60  ;;  %v1345_v27 = vmul.f32 %v2584_v28, %v1320_v39  ;;  %v2628_v31 = vld [vmem:[#allocation2 + $0x52] sm:$0xff]  ;;  %v1075_v57 = vld [vmem:[#allocation2 + $0x8] sm:$0xff]  ;;  %v1291_v37 = vmul.f32 %v2567_v6, %v2622_v16  ;;  %v1158_v9 = vmul.f32 %v2545_v45, %v1079_v8 }
 0x167   : > { %v1102_v56 = vmul.f32 %v2535_v29, %v1077_v30  ;;  %v1192_v21 = vld [vmem:[#allocation2 + $0x21] sm:$0xff]  ;;  %v1269_v12 = vadd.f32 %v1253_v62, %v1232_v38  ;;  %v1190_v48 = vld [vmem:[#allocation2 + $0x9] sm:$0xff]  ;;  %v1100_v54 = vmul.f32 %v2535_v29, %v1075_v57  ;;  %v1121_v19 = vmul.f32 %v2540_v32, %v1077_v30 }
 0x168   : > { %v1323_v42 = vld [vmem:[#allocation2 + $0x22] sm:$0xff]  ;;  %v1217_v40 = vmul.f32 %v2557_v3, %v1192_v21  ;;  %v1173_v15 = vadd.f32 %v1157_v50, %v1136_v26  ;;  %v1321_v53 = vld [vmem:[#allocation2 + $0xa] sm:$0xff]  ;;  %v1385_v2 = vmul.f32 %v2589_v35, %v1325_v1  ;;  %v1422_v17 = vmul.f32 %v2594_v49, %v2628_v31  ;;  %v2651_v26 = vld [vmem:[%s2978_s6] ss:$0 sm:$0xff] }
 0x169   : > { %v1139_v24 = vadd.f32 %v1123_v46, %v1102_v56  ;;  %v1348_v22 = vmul.f32 %v2584_v28, %v1323_v42  ;;  %v1306_v63 = vadd.f32 %v1290_v0, %v1269_v12  ;;  %v1137_v50 = vadd.f32 %v1121_v19, %v1100_v54  ;;  %v2641_v18 = vld [vmem:[#allocation2 + $0x68] sm:$0xff] }
 0x16a   : > { %v1230_v59 = vadd.f32 %v1214_v10, %v1173_v15  ;;  %v1215_v25 = vmul.f32 %v2557_v3, %v1190_v48  ;;  %v1252_v0 = vmul.f32 %v2562_v43, %v1192_v21  ;;  %v1289_v39 = vmul.f32 %v2567_v6, %v1194_v7  ;;  %v2656_v12 = vld [vmem:[#allocation2 + $0x69] sm:$0xff]  ;;  %v2659_v15 = vld [vmem:[#allocation2 + $0x60] sm:$0xff] }
 0x16b   : > { %v1176_v14 = vadd.f32 %v1160_v33, %v1139_v24  ;;  %v1363_v62 = vadd.f32 %v1347_v52, %v1306_v63  ;;  %v1346_v30 = vmul.f32 %v2584_v28, %v1321_v53  ;;  %v1174_v10 = vadd.f32 %v1158_v9, %v1137_v50 }
 0x16c   : > { %v1267_v58 = vadd.f32 %v1251_v47, %v1230_v59  ;;  %v1104_v56 = vmul.f32 %v2535_v29, %v1079_v8  ;;  %v1125_v52 = vmul.f32 %v2540_v32, %v2615_v23  ;;  %v1383_v47 = vmul.f32 %v2589_v35, %v1323_v42 }
 0x16d   : > { %v1233_v60 = vadd.f32 %v1217_v40, %v1176_v14  ;;  %v1400_v38 = vadd.f32 %v1384_v41, %v1363_v62  ;;  %v1162_v33 = vmul.f32 %v2545_v45, %v2641_v18  ;;  %v1231_v40 = vadd.f32 %v1215_v25, %v1174_v10  ;;  %v2673_v62 = vld [vmem:[#allocation2 + $0x61] sm:$0xff] }
 0x16e   : > { %v1304_v21 = vadd.f32 %v1288_v34, %v1267_v58  ;;  %v1141_v8 = vadd.f32 %v1125_v52, %v1104_v56  ;;  %v1219_v57 = vmul.f32 %v2557_v3, %v1194_v7  ;;  %v1420_v63 = vmul.f32 %v2594_v49, %v1325_v1  ;;  %v2668_v7 = vld [vmem:[#allocation2 + $0x6a] sm:$0xff] }
 0x16f   : > { %v1270_v46 = vadd.f32 %v1254_v55, %v1233_v60  ;;  %v1437_v41 = vadd.f32 %v1421_v61, %v1400_v38  ;;  %v1256_v34 = vmul.f32 %v2562_v43, %v2622_v16  ;;  %v1268_v55 = vadd.f32 %v1252_v0, %v1231_v40  ;;  %v2688_v38 = vld [vmem:[#allocation2 + $0x80] sm:$0xff] }
 0x170   : > { %v1361_v24 = vadd.f32 %v1345_v27, %v1304_v21  ;;  %v1178_v54 = vadd.f32 %v1162_v33, %v1141_v8  ;;  %v1293_v61 = vmul.f32 %v2567_v6, %v2656_v12  ;;  %v1350_v27 = vmul.f32 %v2584_v28, %v1325_v1  ;;  %v2697_v8 = vld [vmem:[#allocation2 + $0x62] sm:$0xff] }
 0x171   : > { %v1307_v48 = vadd.f32 %v1291_v37, %v1270_v46  ;;  %v1460_v42 = vadd.f32 %v2651_v26, %v1437_v41  ;;  %v1161_v37 = vmul.f32 %v2545_v45, %v2659_v15  ;;  %v1305_v59 = vadd.f32 %v1289_v39, %v1268_v55 }
 0x172   : > { %v1398_v19 = vadd.f32 %v2613_v5, %v1361_v24  ;;  %v1235_v14 = vadd.f32 %v1219_v57, %v1178_v54  ;;  %v1218_v50 = vmul.f32 %v2557_v3, %v2550_v20  ;;  %v1387_v60 = vmul.f32 %v2589_v35, %v2628_v31 }
 0x173   : > { %v1364_v9 = vadd.f32 %v1348_v22, %v1307_v48  ;;  %v1476_v53 = vmax.f32 %v1460_v42, 0.0  ;;  %v1177_v5 = vadd.f32 %v1161_v37, %v2603_v51  ;;  %v1255_v22 = vmul.f32 %v2562_v43, %v2552_v13 }
 0x174   : > { %v1435_v25 = vadd.f32 %v1419_v36, %v1398_v19  ;;  %v1362_v1 = vadd.f32 %v1346_v30, %v1305_v59  ;;  %v1272_v58 = vadd.f32 %v1256_v34, %v1235_v14  ;;  %v1424_v39 = vmul.f32 %v2594_v49, %v2668_v7  ;;  %v2706_v34 = vld [vmem:[#allocation2 + $0x78] sm:$0xff] }
 0x175   : > { %v1401_v0 = vadd.f32 %v1385_v2, %v1364_v9  ;;  %1526 = vrot.lane.b32.xlu1 %v1476_v53, %s1894_s15  ;;  %v1234_v2 = vadd.f32 %v1218_v50, %v1177_v5  ;;  %v1292_v51 = vmul.f32 %v2567_v6, %v2673_v62  ;;  %v1349_v30 = vmul.f32 %v2584_v28, %v2572_v4  ;;  %v2732_v5 = vld [vmem:[#allocation2 + $0x98] sm:$0xff] }
 0x176   : > { %v1458_v20 = vadd.f32 %v2651_v26, %v1435_v25  ;;  %v1399_v10 = vadd.f32 %v1383_v47, %v1362_v1  ;;  %v1309_v56 = vadd.f32 %v1293_v61, %v1272_v58  ;;  %v1106_v52 = vmul.f32 %v2535_v29, %v2615_v23  ;;  %v2715_v61 = vld [vmem:[#allocation2 + $0x81] sm:$0xff] }
 0x177   : > { %v1438_v36 = vadd.f32 %v1422_v17, %v1401_v0  ;;  %v1271_v33 = vadd.f32 %v1255_v22, %v1234_v2  ;;  %v1127_v17 = vmul.f32 %v2540_v32, %v2641_v18  ;;  %v1386_v47 = vmul.f32 %v2589_v35, %v2574_v11  ;;  %v2743_v2 = vld [vmem:[#allocation2 + $0x7a] sm:$0xff] }
 0x178   : > { %v1474_v21 = vmax.f32 %v1458_v20, 0.0  ;;  %v1436_v41 = vadd.f32 %v1420_v63, %v1399_v10  ;;  %v1366_v40 = vadd.f32 %v1350_v27, %v1309_v56  ;;  %v1164_v4 = vmul.f32 %v2545_v45, %v2688_v38 }
 0x179   : > { %v1461_v46 = vadd.f32 %v2651_v26, %v1438_v36  ;;  %v1308_v57 = vadd.f32 %v1292_v51, %v1271_v33  ;;  %v1143_v24 = vadd.f32 %v1127_v17, %v1106_v52  ;;  %v1221_v48 = vmul.f32 %v2557_v3, %v2622_v16  ;;  %v2741_v36 = vld [vmem:[#allocation2 + $0x79] sm:$0xff]  ;;  %v2756_v17 = vld [vmem:[#allocation2 + $0x90] sm:$0xff] }
 0x17a   : > { %1522 = vrot.lane.b32.xlu0 %v1474_v21, %s1894_s15  ;;  %v1220_v63 = vmul.f32 %v2557_v3, %v2552_v13  ;;  %v2712_v42 = vmul.f32 %v2584_v28, %v2574_v11  ;;  %v1459_v55 = vadd.f32 %v2651_v26, %v1436_v41  ;;  %v1403_v54 = vadd.f32 %v1387_v60, %v1366_v40  ;;  %v2722_v13 = vld [vmem:[#allocation2 + $0x82] sm:$0xff] }
 0x17b   : > { %v1477_v23 = vmax.f32 %v1461_v46, 0.0  ;;  %v1365_v19 = vadd.f32 %v1349_v30, %v1308_v57  ;;  %v1423_v16 = vmul.f32 %v2594_v49, %v2697_v8  ;;  %v1180_v9 = vadd.f32 %v1164_v4, %v1143_v24  ;;  %v2765_v4 = vld [vmem:[#allocation2 + $0x99] sm:$0xff] }
 0x17c   : > { %v1258_v27 = vmul.f32 %v2562_v43, %v2656_v12  ;;  %v1475_v37 = vmax.f32 %v1459_v55, 0.0  ;;  %v1440_v11 = vadd.f32 %v1424_v39, %v1403_v54  ;;  %v1126_v53 = vmul.f32 %v2540_v32, %v2659_v15  ;;  %v2769_v55 = vld [vmem:[#allocation2 + $0x9a] sm:$0xff] }
 0x17d   : > { %1528 = vrot.lane.b32.xlu1 %v1477_v23, %s1894_s15  ;;  %v1163_v59 = vmul.f32 %v2545_v45, %v2706_v34  ;;  %v1402_v14 = vadd.f32 %v1386_v47, %v1365_v19  ;;  %v1237_v50 = vadd.f32 %v1221_v48, %v1180_v9  ;;  %v1295_v25 = vmul.f32 %v2567_v6, %v2715_v61 }
 0x17e   : > { %v1352_v0 = vmul.f32 %v2584_v28, %v2628_v31  ;;  %1524 = vrot.lane.b32.xlu0 %v1475_v37, %s1894_s15  ;;  %v1463_v22 = vadd.f32 %v2651_v26, %v1440_v11  ;;  %v1389_v1 = vmul.f32 %v2589_v35, %v2668_v7  ;;  %v1426_v58 = vmul.f32 %v2594_v49, %v2722_v13 }
 0x17f   : > { %v1142_v60 = vadd.f32 %v1126_v53, %v2598_v44  ;;  %v1439_v39 = vadd.f32 %v1423_v16, %v1402_v14  ;;  %v1274_v20 = vadd.f32 %v1258_v27, %v1237_v50  ;;  %v1108_v31 = vmul.f32 %v2535_v29, %v2641_v18  ;;  %v2788_v50 = vld [vmem:[#allocation2 + $0xb0] sm:$0xff] }
 0x180   : > { %v1129_v51 = vmul.f32 %v2540_v32, %v2688_v38  ;;  %v1479_v10 = vmax.f32 %v1463_v22, 0.0  ;;  %v1257_v30 = vmul.f32 %v2562_v43, %v2673_v62  ;;  %v1166_v44 = vmul.f32 %v2545_v45, %v2732_v5 }
 0x181   : > { %v1179_v56 = vadd.f32 %v1163_v59, %v1142_v60  ;;  %v1462_v52 = vadd.f32 %v2651_v26, %v1439_v39  ;;  %v1311_v21 = vadd.f32 %v1295_v25, %v1274_v20  ;;  %v1223_v33 = vmul.f32 %v2557_v3, %v2656_v12  ;;  %v2784_v59 = vld [vmem:[#allocation2 + $0x91] sm:$0xff] }
 0x182   : > { %v1145_v46 = vadd.f32 %v1129_v51, %v1108_v31  ;;  %1532 = vrot.lane.b32.xlu1 %v1479_v10, %s1894_s15  ;;  %v1294_v41 = vmul.f32 %v2567_v6, %v2741_v36  ;;  %v1388_v40 = vmul.f32 %v2589_v35, %v2697_v8  ;;  %v1425_v47 = vmul.f32 %v2594_v49, %v2743_v2 }
 0x183   : > { %v1236_v18 = vadd.f32 %v1220_v63, %v1179_v56  ;;  %v1478_v23 = vmax.f32 %v1462_v52, 0.0  ;;  %v1368_v57 = vadd.f32 %v1352_v0, %v1311_v21  ;;  %v1260_v12 = vmul.f32 %v2562_v43, %v2715_v61 }
 0x184   : > { %v1182_v24 = vadd.f32 %v1166_v44, %v1145_v46  ;;  %v1107_v63 = vmul.f32 %v2535_v29, %v2659_v15  ;;  %v1128_v54 = vmul.f32 %v2540_v32, %v2706_v34  ;;  %v1165_v19 = vmul.f32 %v2545_v45, %v2756_v17 }
 0x185   : > { %v1273_v48 = vadd.f32 %v1257_v30, %v1236_v18  ;;  %1530 = vrot.lane.b32.xlu0 %v1478_v23, %s1894_s15  ;;  %v1405_v16 = vadd.f32 %v1389_v1, %v1368_v57  ;;  %v1297_v27 = vmul.f32 %v2567_v6, %v2765_v4  ;;  %v1354_v37 = vmul.f32 %v2584_v28, %v2668_v7 }
 0x186   : > { %v1239_v9 = vadd.f32 %v1223_v33, %v1182_v24  ;;  %v1391_v15 = vmul.f32 %v2589_v35, %v2722_v13  ;;  %v1144_v53 = vadd.f32 %v1128_v54, %v1107_v63  ;;  %v1222_v14 = vmul.f32 %v2557_v3, %v2673_v62  ;;  %v2812_v33 = vld [vmem:[#allocation2 + $0xa8] sm:$0xff] }
 0x187   : > { %v1310_v11 = vadd.f32 %v1294_v41, %v1273_v48  ;;  %v1442_v25 = vadd.f32 %v1426_v58, %v1405_v16  ;;  %v1428_v22 = vmul.f32 %v2594_v49, %v2769_v55  ;;  %v1259_v7 = vmul.f32 %v2562_v43, %v2741_v36 }
 0x188   : > { %v1276_v0 = vadd.f32 %v1260_v12, %v1239_v9  ;;  %v1181_v60 = vadd.f32 %v1165_v19, %v1144_v53  ;;  %v1110_v39 = vmul.f32 %v2535_v29, %v2688_v38  ;;  %v1131_v20 = vmul.f32 %v2540_v32, %v2732_v5 }
 0x189   : > { %v1367_v1 = vadd.f32 %v2712_v42, %v1310_v11  ;;  %v1465_v62 = vadd.f32 %v2651_v26, %v1442_v25  ;;  %v1296_v58 = vmul.f32 %v2567_v6, %v2784_v59  ;;  %v1168_v51 = vmul.f32 %v2545_v45, %v2788_v50  ;;  %v2804_v42 = vld [vmem:[#allocation2 + $0xb1] sm:$0xff] }
 0x18a   : > { %v1313_v31 = vadd.f32 %v1297_v27, %v1276_v0  ;;  %v1238_v56 = vadd.f32 %v1222_v14, %v1181_v60  ;;  %v1147_v30 = vadd.f32 %v1131_v20, %v1110_v39  ;;  %v1225_v38 = vmul.f32 %v2557_v3, %v2715_v61  ;;  %v2830_v27 = vld [vmem:[#allocation2 + $0xa9] sm:$0xff]  ;;  %v2837_v0 = vld [vmem:[#allocation2 + $0xb2] sm:$0xff] }
 0x18b   : > { %v1404_v10 = vadd.f32 %v1388_v40, %v1367_v1  ;;  %v1481_v44 = vmax.f32 %v1465_v62, 0.0  ;;  %v1353_v21 = vmul.f32 %v2584_v28, %v2697_v8  ;;  %v1390_v46 = vmul.f32 %v2589_v35, %v2743_v2  ;;  %v2814_v40 = vld [vmem:[#allocation2 + $0x92] sm:$0xff]  ;;  %v1091_v14 = vld [vmem:[#allocation2 + $0xc8] sm:$0xff] }
 0x18c   : > { %v1370_v52 = vadd.f32 %v1354_v37, %v1313_v31  ;;  %v1275_v41 = vadd.f32 %v1259_v7, %v1238_v56  ;;  %v1184_v23 = vadd.f32 %v1168_v51, %v1147_v30  ;;  %v1262_v57 = vmul.f32 %v2562_v43, %v2765_v4  ;;  %v2848_v31 = vld [vmem:[#allocation2 + $0xaa] sm:$0xff] }
 0x18d   : > { %v1441_v18 = vadd.f32 %v1425_v47, %v1404_v10  ;;  %1536 = vrot.lane.b32.xlu1 %v1481_v44, %s1894_s15  ;;  %v1299_v24 = vmul.f32 %v2567_v6, %v2804_v42  ;;  %v1109_v8 = vmul.f32 %v2535_v29, %v2706_v34  ;;  %v1130_v12 = vmul.f32 %v2540_v32, %v2756_v17 }
 0x18e   : > { %v1407_v61 = vadd.f32 %v1391_v15, %v1370_v52  ;;  %v1312_v48 = vadd.f32 %v1296_v58, %v1275_v41  ;;  %v1241_v63 = vadd.f32 %v1225_v38, %v1184_v23  ;;  %v1167_v54 = vmul.f32 %v2545_v45, %v2812_v33 }
 0x18f   : > { %v1464_v47 = vadd.f32 %v2651_v26, %v1441_v18  ;;  %v1427_v16 = vmul.f32 %v2594_v49, %v2814_v40  ;;  %v1146_v9 = vadd.f32 %v1130_v12, %v1109_v8  ;;  %v1224_v34 = vmul.f32 %v2557_v3, %v2741_v36  ;;  %v1090_v18 = vld [vmem:[#allocation2 + $0xc0] sm:$0xff] }
 0x190   : > { %v1444_v19 = vadd.f32 %v1428_v22, %v1407_v61  ;;  %v1369_v11 = vadd.f32 %v1353_v21, %v1312_v48  ;;  %v1278_v15 = vadd.f32 %v1262_v57, %v1241_v63  ;;  %v1356_v53 = vmul.f32 %v2584_v28, %v2722_v13  ;;  %v1206_v21 = vld [vmem:[#allocation2 + $0xc9] sm:$0xff] }
 0x191   : > { %v1480_v37 = vmax.f32 %v1464_v47, 0.0  ;;  %v1393_v22 = vmul.f32 %v2589_v35, %v2769_v55  ;;  %v1183_v7 = vadd.f32 %v1167_v54, %v1146_v9  ;;  %v1261_v1 = vmul.f32 %v2562_v43, %v2784_v59 }
 0x192   : > { %v1467_v25 = vadd.f32 %v2651_v26, %v1444_v19  ;;  %v1406_v36 = vadd.f32 %v1390_v46, %v1369_v11  ;;  %v1315_v60 = vadd.f32 %v1299_v24, %v1278_v15  ;;  %v1298_v39 = vmul.f32 %v2567_v6, %v2830_v27  ;;  %v1205_v15 = vld [vmem:[#allocation2 + $0xc1] sm:$0xff] }
 0x193   : > { %1534 = vrot.lane.b32.xlu0 %v1480_v37, %s1894_s15  ;;  %v1112_v13 = vmul.f32 %v2535_v29, %v2732_v5  ;;  %v1240_v62 = vadd.f32 %v1224_v34, %v1183_v7  ;;  %v1133_v58 = vmul.f32 %v2540_v32, %v2788_v50  ;;  %v1170_v51 = vmul.f32 %v2545_v45, %v1091_v14  ;;  %v1093_v34 = vld [vmem:[#allocation2 + $0xe0] sm:$0xff] }
 0x194   : > { %v1483_v20 = vmax.f32 %v1467_v25, 0.0  ;;  %v1443_v10 = vadd.f32 %v1427_v16, %v1406_v36  ;;  %v1372_v56 = vadd.f32 %v1356_v53, %v1315_v60  ;;  %v1430_v30 = vmul.f32 %v2594_v49, %v2837_v0 }
 0x195   : > { %v1355_v38 = vmul.f32 %v2584_v28, %v2743_v2  ;;  %v1277_v5 = vadd.f32 %v1261_v1, %v1240_v62  ;;  %v1392_v44 = vmul.f32 %v2589_v35, %v2814_v40  ;;  %v1149_v52 = vadd.f32 %v1133_v58, %v1112_v13 }
 0x196   : > { %1540 = vrot.lane.b32.xlu1 %v1483_v20, %s1894_s15  ;;  %v1227_v46 = vmul.f32 %v2557_v3, %v2765_v4  ;;  %v1466_v41 = vadd.f32 %v2651_v26, %v1443_v10  ;;  %v1409_v23 = vadd.f32 %v1393_v22, %v1372_v56  ;;  %v1429_v57 = vmul.f32 %v2594_v49, %v2848_v31  ;;  %v1337_v22 = vld [vmem:[#allocation2 + $0xca] sm:$0xff]  ;;  %v1092_v56 = vld [vmem:[#allocation2 + $0xd8] sm:$0xff] }
 0x197   : > { %v1264_v2 = vmul.f32 %v2562_v43, %v2804_v42  ;;  %v1314_v61 = vadd.f32 %v1298_v39, %v1277_v5  ;;  %v1186_v24 = vadd.f32 %v1170_v51, %v1149_v52  ;;  %v1111_v8 = vmul.f32 %v2535_v29, %v2756_v17  ;;  %v1336_v52 = vld [vmem:[#allocation2 + $0xc2] sm:$0xff] }
 0x198   : > { %v1132_v12 = vmul.f32 %v2540_v32, %v2812_v33  ;;  %v1482_v47 = vmax.f32 %v1466_v41, 0.0  ;;  %v1446_v4 = vadd.f32 %v1430_v30, %v1409_v23  ;;  %v1301_v48 = vmul.f32 %v2567_v6, %v1206_v21 }
 0x199   : > { %v1169_v63 = vmul.f32 %v2545_v45, %v1090_v18  ;;  %v1371_v54 = vadd.f32 %v1355_v38, %v1314_v61  ;;  %v1243_v19 = vadd.f32 %v1227_v46, %v1186_v24  ;;  %v1226_v9 = vmul.f32 %v2557_v3, %v2784_v59 }
 0x19a   : > { %v1148_v16 = vadd.f32 %v1132_v12, %v1111_v8  ;;  %1538 = vrot.lane.b32.xlu0 %v1482_v47, %s1894_s15  ;;  %v1469_v17 = vadd.f32 %v2651_v26, %v1446_v4  ;;  %v1358_v37 = vmul.f32 %v2584_v28, %v2769_v55  ;;  %v1395_v11 = vmul.f32 %v2589_v35, %v2837_v0 }
 0x19b   : > { %v1408_v53 = vadd.f32 %v1392_v44, %v1371_v54  ;;  %v1280_v25 = vadd.f32 %v1264_v2, %v1243_v19  ;;  %v1263_v1 = vmul.f32 %v2562_v43, %v2830_v27  ;;  %v1114_v36 = vmul.f32 %v2535_v29, %v2788_v50  ;;  %v1208_v44 = vld [vmem:[#allocation2 + $0xe1] sm:$0xff] }
 0x19c   : > { %v1185_v7 = vadd.f32 %v1169_v63, %v1148_v16  ;;  %v1485_v59 = vmax.f32 %v1469_v17, 0.0  ;;  %v1135_v60 = vmul.f32 %v2540_v32, %v1091_v14  ;;  %v1172_v39 = vmul.f32 %v2545_v45, %v1093_v34  ;;  %v1339_v19 = vld [vmem:[#allocation2 + $0xe2] sm:$0xff] }
 0x19d   : > { %v1445_v55 = vadd.f32 %v1429_v57, %v1408_v53  ;;  %v1317_v13 = vadd.f32 %v1301_v48, %v1280_v25  ;;  %v1300_v62 = vmul.f32 %v2567_v6, %v1205_v15  ;;  %v1432_v58 = vmul.f32 %v2594_v49, %v1337_v22 }
 0x19e   : > { %v1242_v20 = vadd.f32 %v1226_v9, %v1185_v7  ;;  %1544 = vrot.lane.b32.xlu1 %v1485_v59, %s1894_s15  ;;  %v1357_v51 = vmul.f32 %v2584_v28, %v2814_v40  ;;  %v1151_v10 = vadd.f32 %v1135_v60, %v1114_v36  ;;  %v1229_v50 = vmul.f32 %v2557_v3, %v2804_v42 }
 0x19f   : > { %v1468_v14 = vadd.f32 %v2651_v26, %v1445_v55  ;;  %v1374_v30 = vadd.f32 %v1358_v37, %v1317_v13  ;;  %v1394_v5 = vmul.f32 %v2589_v35, %v2848_v31  ;;  %v1266_v41 = vmul.f32 %v2562_v43, %v1206_v21 }
 0x1a0   : > { %v1279_v38 = vadd.f32 %v1263_v1, %v1242_v20  ;;  %v1188_v46 = vadd.f32 %v1172_v39, %v1151_v10  ;;  %v1113_v40 = vmul.f32 %v2535_v29, %v2812_v33  ;;  %v1134_v23 = vmul.f32 %v2540_v32, %v1090_v18  ;;  %v1207_v33 = vld [vmem:[#allocation2 + $0xd9] sm:$0xff] }
 0x1a1   : > { %v1484_v57 = vmax.f32 %v1468_v14, 0.0  ;;  %v1411_v42 = vadd.f32 %v1395_v11, %v1374_v30  ;;  %v1171_v61 = vmul.f32 %v2545_v45, %v1092_v56  ;;  %v1303_v8 = vmul.f32 %v2567_v6, %v1208_v44 }
 0x1a2   : > { %v1316_v2 = vadd.f32 %v1300_v62, %v1279_v38  ;;  %v1245_v24 = vadd.f32 %v1229_v50, %v1188_v46  ;;  %v1150_v12 = vadd.f32 %v1134_v23, %v1113_v40  ;;  %v1228_v47 = vmul.f32 %v2557_v3, %v2830_v27 }
 0x1a3   : > { %1542 = vrot.lane.b32.xlu0 %v1484_v57, %s1894_s15  ;;  %v1448_v21 = vadd.f32 %v1432_v58, %v1411_v42  ;;  %v1431_v29 = vmul.f32 %v2594_v49, %v1336_v52  ;;  %v1360_v18 = vmul.f32 %v2584_v28, %v2837_v0  ;;  %v1265_v45 = vmul.f32 %v2562_v43, %v1205_v15  ;;  %v1338_v15 = vld [vmem:[#allocation2 + $0xda] sm:$0xff] }
 0x1a4   : > { %v1373_v4 = vadd.f32 %v1357_v51, %v1316_v2  ;;  %v1282_v32 = vadd.f32 %v1266_v41, %v1245_v24  ;;  %v1187_v48 = vadd.f32 %v1171_v61, %v1150_v12  ;;  %v1397_v3 = vmul.f32 %v2589_v35, %v1337_v22 }
 0x1a5   : > { %v1471_v63 = vadd.f32 %v2651_v26, %v1448_v21  ;;  %v1302_v9 = vmul.f32 %v2567_v6, %v1207_v33  ;;  %v1434_v11 = vmul.f32 %v2594_v49, %v1339_v19  ;;  %v1359_v0 = vmul.f32 %v2584_v28, %v2848_v31 }
 0x1a6   : > { %v1410_v54 = vadd.f32 %v1394_v5, %v1373_v4  ;;  %v1319_v16 = vadd.f32 %v1303_v8, %v1282_v32  ;;  %v1244_v27 = vadd.f32 %v1228_v47, %v1187_v48  ;;  %v1396_v22 = vmul.f32 %v2589_v35, %v1336_v52 }
 0x1a7   : > { %v1487_v34 = vmax.f32 %v1471_v63, 0.0  ;;  %v1433_v36 = vmul.f32 %v2594_v49, %v1338_v15 }
 0x1a8   : > { %v1447_v17 = vadd.f32 %v1431_v29, %v1410_v54  ;;  %v1376_v37 = vadd.f32 %v1360_v18, %v1319_v16  ;;  %v1281_v53 = vadd.f32 %v1265_v45, %v1244_v27 }
 0x1a9   : > { %1548 = vrot.lane.b32.xlu1 %v1487_v34, %s1894_s15 }
 0x1aa   : > { %v1470_v43 = vadd.f32 %v2651_v26, %v1447_v17  ;;  %v1413_v25 = vadd.f32 %v1397_v3, %v1376_v37  ;;  %v1318_v7 = vadd.f32 %v1302_v9, %v1281_v53 }
 0x1ac   : > { %v1486_v6 = vmax.f32 %v1470_v43, 0.0  ;;  %v1450_v1 = vadd.f32 %v1434_v11, %v1413_v25  ;;  %v1375_v59 = vadd.f32 %v1359_v0, %v1318_v7 }
 0x1ae   : > { %1546 = vrot.lane.b32.xlu0 %v1486_v6, %s1894_s15  ;;  %v1473_v28 = vadd.f32 %v2651_v26, %v1450_v1  ;;  %v1412_v31 = vadd.f32 %v1396_v22, %v1375_v59 }
 0x1b0   : > { %v1489_v60 = vmax.f32 %v1473_v28, 0.0  ;;  %v1449_v39 = vadd.f32 %v1433_v36, %v1412_v31 }
 0x1b2   : > { %1552 = vrot.lane.b32.xlu1 %v1489_v60, %s1894_s15  ;;  %v1472_v35 = vadd.f32 %v2651_v26, %v1449_v39 }
 0x1b4   : > { %v1488_v55 = vmax.f32 %v1472_v35, 0.0 }
 0x1b6   : > { %1550 = vrot.lane.b32.xlu0 %v1488_v55, %s1894_s15 }
 0x1e7   : > { %v1527_v49 = vpop.permute.xlu1 %1526 }
 0x1e8   : > { %1573 = vst.msk [vmem:[%s1985_s21 + $0x10] sm:$0xff] %vm1570_vm4, %v1527_v49 }
 0x1ec   : > { %v1523_v13 = vpop.permute.xlu0 %1522 }
 0x1ed   : > { %1571 = vst.msk [vmem:[%s1985_s21] sm:$0xff] %vm1570_vm4, %v1523_v13 }
 0x1ef   : > { %v1529_v20 = vpop.permute.xlu1 %1528 }
 0x1f0   : > { %1574 = vst.msk [vmem:[%s1985_s21 + $0x18] sm:$0xff] %vm1570_vm4, %v1529_v20  ;;  %v1525_v62 = vpop.permute.xlu0 %1524 }
 0x1f1   : > { %1572 = vst.msk [vmem:[%s1985_s21 + $0x8] sm:$0xff] %vm1570_vm4, %v1525_v62 }
 0x1f4   : > { %v1533_v26 = vpop.permute.xlu1 %1532 }
 0x1f5   : > { %1576 = vst.msk [vmem:[%s1985_s21 + $0x28] sm:$0xff] %vm1570_vm4, %v1533_v26 }
 0x1f7   : > { %v1531_v58 = vpop.permute.xlu0 %1530 }
 0x1f8   : > { %1575 = vst.msk [vmem:[%s1985_s21 + $0x20] sm:$0xff] %vm1570_vm4, %v1531_v58 }
 0x1ff   : > { %v1537_v51 = vpop.permute.xlu1 %1536 }
 0x200   : > { %1578 = vst.msk [vmem:[%s1985_s21 + $0x38] sm:$0xff] %vm1570_vm4, %v1537_v51 }
 0x205   : > { %v1535_v10 = vpop.permute.xlu0 %1534 }
 0x206   : > { %1577 = vst.msk [vmem:[%s1985_s21 + $0x30] sm:$0xff] %vm1570_vm4, %v1535_v10 }
 0x208   : > { %v1541_v50 = vpop.permute.xlu1 %1540 }
 0x209   : > { %1580 = vst.msk [vmem:[%s1985_s21 + $0x48] sm:$0xff] %vm1570_vm4, %v1541_v50 }
 0x20c   : > { %v1539_v56 = vpop.permute.xlu0 %1538 }
 0x20d   : > { %1579 = vst.msk [vmem:[%s1985_s21 + $0x40] sm:$0xff] %vm1570_vm4, %v1539_v56 }
 0x210   : > { %v1545_v14 = vpop.permute.xlu1 %1544 }
 0x211   : > { %1582 = vst.msk [vmem:[%s1985_s21 + $0x58] sm:$0xff] %vm1570_vm4, %v1545_v14 }
 0x215   : > { %v1543_v30 = vpop.permute.xlu0 %1542 }
 0x216   : > { %1581 = vst.msk [vmem:[%s1985_s21 + $0x50] sm:$0xff] %vm1570_vm4, %v1543_v30 }
 0x21b   : > { %v1549_v38 = vpop.permute.xlu1 %1548 }
 0x21c   : > { %1584 = vst.msk [vmem:[%s1985_s21 + $0x68] sm:$0xff] %vm1570_vm4, %v1549_v38 }
 0x220   : > { %v1547_v5 = vpop.permute.xlu0 %1546 }
 0x221   : > { %1583 = vst.msk [vmem:[%s1985_s21 + $0x60] sm:$0xff] %vm1570_vm4, %v1547_v5 }
 0x224   : > { %v1553_v44 = vpop.permute.xlu1 %1552 }
 0x225   : > { %1586 = vst.msk [vmem:[%s1985_s21 + $0x78] sm:$0xff] %vm1570_vm4, %v1553_v44 }
 0x228   : > { %v1551_v52 = vpop.permute.xlu0 %1550 }
 0x229   : > { %1585 = vst.msk [vmem:[%s1985_s21 + $0x70] sm:$0xff] %vm1570_vm4, %v1551_v52 }
 0x22a PF: > { %s17_s28 = sadd.s32 1, %s1885_s28   ;;  %s2981_s24 = smov %s1877_s26 }
 0x22b   : > { %p14_p12 = scmp.ge.s32.totalorder %s17_s28, 6   ;;  %s2982_s25 = smov %s1881_s27 }
 0x22c   : > { %s2983_s26 = smov %s2986_s29  ;;  %s2984_s27 = smov %s2990_s30 }
 0x22d   :  { %16 = sbr.rel (!%p14_p12) target bundleno = 3 (0x3), region = 94 }

</bundles_post_ra>
